<compile_context>
chip_gen: v6e
topology: v6e:2x2x1
jax: 0.10.0
libtpu: 0.0.40
codegen_flags: <defaults>
</compile_context>

<pallas_src>
import math
from dataclasses import dataclass
from functools import partial

import jax
import jax.numpy as jnp
from jax import lax
from jax.experimental import pallas as pl
from jax.experimental.pallas import tpu as pltpu


# ----------------------------------------------------------------------------
# helpers
# ----------------------------------------------------------------------------
def _silu(x):
    # x * sigmoid(x); divide goes to the EUP via approx reciprocal.
    return x * pl.reciprocal(1.0 + jnp.exp(-x), approx=True)


def _rmsnorm(x, w, eps):
    ms = jnp.mean(x * x, axis=-1, keepdims=True)
    return x * lax.rsqrt(ms + eps) * w


def _rep_spec(shape):
    """Whole-array block, replicated across the batch grid axis."""
    nd = len(shape)
    return pl.BlockSpec(shape, lambda b: (0,) * nd)


# ----------------------------------------------------------------------------
# Fused ResidualBlock kernel:  out = x + MambaBlock(RMSNorm(x))     (one batch)
# ----------------------------------------------------------------------------
def _mamba_layer_kernel(x_ref, normw_ref, inw_ref, convw_ref, convb_ref,
                        xpw_ref, dtw_ref, dtb_ref, A_ref, Dp_ref, outw_ref,
                        o_ref, *, L, d_in, n_state, dt_rank, k_conv, eps):
    x = x_ref[...]                                           # (L, D) f32, time = rows
    xn = _rmsnorm(x, normw_ref[...], eps)

    # ---- in_proj (no bias), bf16 MXU, f32 accumulate ------------------------
    xr = jnp.dot(xn.astype(jnp.bfloat16), inw_ref[...],
                 preferred_element_type=jnp.float32)         # (L, 2*d_in)
    xs = xr[:, :d_in]
    res = xr[:, d_in:]

    # ---- depthwise causal conv (padding=K-1, truncated to L) + SiLU ---------
    w = convw_ref[...]                                       # (K, d_in)
    acc = xs * w[k_conv - 1:k_conv, :]                       # shift-0 tap
    for k in range(k_conv - 1):                              # static, tiny
        s = k_conv - 1 - k                                   # time shift
        shifted = jnp.concatenate(
            [jnp.zeros((s, d_in), jnp.float32), xs[:L - s, :]], axis=0)
        acc = acc + shifted * w[k:k + 1, :]
    acc = acc + convb_ref[...]
    u = _silu(acc)                                           # (L, d_in)

    # ---- x_proj (no bias) -> (dt, B, C);  dt_proj (bias) ---------------------
    x_dbl = jnp.dot(u.astype(jnp.bfloat16), xpw_ref[...],
                    preferred_element_type=jnp.float32)      # (L, dt_rank + 2n)
    dt_in = x_dbl[:, :dt_rank]
    Bm = x_dbl[:, dt_rank:dt_rank + n_state]                 # (L, n)
    Cm = x_dbl[:, dt_rank + n_state:]                        # (L, n)
    dt = jnp.dot(dt_in.astype(jnp.bfloat16), dtw_ref[...],
                 preferred_element_type=jnp.float32) + dtb_ref[...]   # (L, d_in)

    # softplus with PyTorch threshold=20 semantics
    sp = jnp.log(1.0 + jnp.exp(jnp.minimum(dt, 20.0)))
    delta = jnp.where(dt > 20.0, dt, sp)                     # (L, d_in)

    # ---- lane-dense SSM tensors, flat layout [n*d_in + c] --------------------
    delta_t = jnp.concatenate([delta] * n_state, axis=1)     # (L, n*d_in)
    u_t = jnp.concatenate([u] * n_state, axis=1)
    B_e = jnp.concatenate(
        [jnp.broadcast_to(Bm[:, i:i + 1], (L, d_in)) for i in range(n_state)],
        axis=1)
    C_e = jnp.concatenate(
        [jnp.broadcast_to(Cm[:, i:i + 1], (L, d_in)) for i in range(n_state)],
        axis=1)
    dA = jnp.exp(delta_t * A_ref[...])                       # (L, n*d_in)
    dBu = delta_t * B_e * u_t                                # (L, n*d_in)
    uD = u * Dp_ref[...]                                     # (L, d_in)

    # ---- sequential selective scan (static unroll; L is small & static) -----
    # TODO(synk): for long sequences switch to lax.fori_loop over VMEM scratch.
    state = jnp.zeros((1, n_state * d_in), jnp.float32)
    ys = []
    for t in range(L):
        state = dA[t:t + 1, :] * state + dBu[t:t + 1, :]
        sc = state * C_e[t:t + 1, :]
        y_t = uD[t:t + 1, :]
        for i in range(n_state):                             # C-reduction: n adds
            y_t = y_t + sc[:, i * d_in:(i + 1) * d_in]
        ys.append(y_t)
    y = jnp.concatenate(ys, axis=0)                          # (L, d_in)

    # ---- gate, out_proj (no bias), residual ----------------------------------
    y = y * _silu(res)
    out = jnp.dot(y.astype(jnp.bfloat16), outw_ref[...],
                  preferred_element_type=jnp.float32)        # (L, D)
    o_ref[...] = x + out


def fused_mamba_layer(x, lp, args):
    B, L, D = x.shape
    din, n, dtr, K = args.d_inner, args.d_state, args.dt_rank, args.d_conv
    return pl.pallas_call(
        partial(_mamba_layer_kernel, L=L, d_in=din, n_state=n,
                dt_rank=dtr, k_conv=K, eps=1e-5),
        out_shape=jax.ShapeDtypeStruct((B, L, D), jnp.float32),
        grid=(B,),
        in_specs=[
            pl.BlockSpec((None, L, D), lambda b: (b, 0, 0)),   # x (per batch)
            _rep_spec((1, D)),                                 # norm_w
            _rep_spec((D, 2 * din)),                           # in_proj_w (bf16)
            _rep_spec((K, din)),                               # conv_w
            _rep_spec((1, din)),                               # conv_b
            _rep_spec((din, dtr + 2 * n)),                     # x_proj_w (bf16)
            _rep_spec((dtr, din)),                             # dt_proj_w (bf16)
            _rep_spec((1, din)),                               # dt_proj_b
            _rep_spec((1, n * din)),                           # A_flat (= -exp(A_log).T)
            _rep_spec((1, din)),                               # D
            _rep_spec((din, D)),                               # out_proj_w (bf16)
        ],
        out_specs=pl.BlockSpec((None, L, D), lambda b: (b, 0, 0)),
        compiler_params=pltpu.CompilerParams(
            dimension_semantics=("parallel",)),
    )(x, lp["norm_w"], lp["in_proj_w"], lp["conv_w"], lp["conv_b"],
      lp["x_proj_w"], lp["dt_proj_w"], lp["dt_proj_b"], lp["A_flat"],
      lp["D"], lp["out_proj_w"])


# ----------------------------------------------------------------------------
# Fused tail kernel: RMSNorm -> cross attention (fused KV proj) -> RMSNorm
# ----------------------------------------------------------------------------
def _attn_tail_kernel(x_ref, normf_ref, wq_ref, bq_ref, wkv_ref, bkv_ref,
                      enc_ref, wo_ref, bo_ref, normf2_ref, o_ref,
                      *, num_heads, head_dim, eps):
    # TODO(synk): src_mask (masked_fill with -1e9) not wired; caller passes None.
    d = x_ref.shape[1]
    x = x_ref[...]                                           # (Lq, D)
    xn = _rmsnorm(x, normf_ref[...], eps)                    # norm_f

    q = (jnp.dot(xn.astype(jnp.bfloat16), wq_ref[...],
                 preferred_element_type=jnp.float32)
         + bq_ref[...]).astype(jnp.bfloat16)                 # (Lq, D)
    enc = enc_ref[...]                                       # (Lk, D)
    kv = jnp.dot(enc.astype(jnp.bfloat16), wkv_ref[...],
                 preferred_element_type=jnp.float32) + bkv_ref[...]   # (Lk, 2D)
    k = kv[:, :d].astype(jnp.bfloat16)
    v = kv[:, d:].astype(jnp.bfloat16)

    scale = 1.0 / math.sqrt(head_dim)
    heads = []
    for h in range(num_heads):                               # static, tiny
        sl = slice(h * head_dim, (h + 1) * head_dim)
        qh, kh, vh = q[:, sl], k[:, sl], v[:, sl]
        s = lax.dot_general(qh, kh, (((1,), (1,)), ((), ())),
                            preferred_element_type=jnp.float32) * scale  # (Lq, Lk)
        m = jnp.max(s, axis=-1, keepdims=True)
        p = jnp.exp(s - m)
        p = p * pl.reciprocal(jnp.sum(p, axis=-1, keepdims=True), approx=True)
        heads.append(jnp.dot(p.astype(jnp.bfloat16), vh,
                             preferred_element_type=jnp.float32))        # (Lq, hd)
    attn = jnp.concatenate(heads, axis=1)                    # (Lq, D)

    o = jnp.dot(attn.astype(jnp.bfloat16), wo_ref[...],
                preferred_element_type=jnp.float32) + bo_ref[...]
    o_ref[...] = _rmsnorm(o, normf2_ref[...], eps)           # norm_f2


def fused_attention_tail(x, enc, ap, args):
    B, Lt, D = x.shape
    Ls = enc.shape[1]
    H = args.num_heads
    Hd = D // H
    return pl.pallas_call(
        partial(_attn_tail_kernel, num_heads=H, head_dim=Hd, eps=1e-5),
        out_shape=jax.ShapeDtypeStruct((B, Lt, D), jnp.float32),
        grid=(B,),
        in_specs=[
            pl.BlockSpec((None, Lt, D), lambda b: (b, 0, 0)),  # x (per batch)
            _rep_spec((1, D)),                                 # norm_f_w
            _rep_spec((D, D)), _rep_spec((1, D)),              # wq, bq
            _rep_spec((D, 2 * D)), _rep_spec((1, 2 * D)),      # wkv, bkv (fused K|V)
            pl.BlockSpec((None, Ls, D), lambda b: (b, 0, 0)),  # encoder output
            _rep_spec((D, D)), _rep_spec((1, D)),              # wo, bo
            _rep_spec((1, D)),                                 # norm_f2_w
        ],
        out_specs=pl.BlockSpec((None, Lt, D), lambda b: (b, 0, 0)),
        compiler_params=pltpu.CompilerParams(
            dimension_semantics=("parallel",)),
    )(x, ap["norm_f_w"], ap["wq_w"], ap["wq_b"], ap["wkv_w"], ap["wkv_b"],
      enc, ap["wo_w"], ap["wo_b"], ap["norm_f2_w"])


# ----------------------------------------------------------------------------
# Model definition
# ----------------------------------------------------------------------------
@dataclass
class ModelArgs:
    d_model: int = 32
    n_layer: int = 2
    vocab_size: int = 64
    d_state: int = 4
    expand: int = 2
    d_conv: int = 4
    num_heads: int = 4

    @property
    def d_inner(self):
        return self.expand * self.d_model

    @property
    def dt_rank(self):
        return math.ceil(self.d_model / 16)


def init_params(key, args: ModelArgs):
    d, din = args.d_model, args.d_inner
    n, dtr, K = args.d_state, args.dt_rank, args.d_conv
    keys = iter(jax.random.split(key, 32))
    bf = jnp.bfloat16

    def nrm(shape, scale=0.05, dtype=jnp.float32):
        return (scale * jax.random.normal(next(keys), shape)).astype(dtype)

    params = {"embedding": nrm((args.vocab_size, d), 0.02)}
    layers = []
    for _ in range(args.n_layer):
        A_log = jnp.log(jnp.tile(
            jnp.arange(1, n + 1, dtype=jnp.float32)[None, :], (din, 1)))  # (din, n)
        # hoisted:  A = -exp(A_log).T, flattened lane-dense as [n*din + c]
        A_flat = (-jnp.exp(A_log)).T.reshape(1, n * din)
        layers.append({
            "norm_w": jnp.ones((1, d), jnp.float32),
            "in_proj_w": nrm((d, 2 * din), dtype=bf),
            "conv_w": nrm((K, din)),
            "conv_b": nrm((1, din)),
            "x_proj_w": nrm((din, dtr + 2 * n), dtype=bf),
            "dt_proj_w": nrm((dtr, din), dtype=bf),
            "dt_proj_b": nrm((1, din), 0.1),
            "A_flat": A_flat,
            "D": jnp.ones((1, din), jnp.float32),
            "out_proj_w": nrm((din, d), dtype=bf),
        })
    params["layers"] = layers
    params["attn"] = {
        "norm_f_w": jnp.ones((1, d), jnp.float32),
        "wq_w": nrm((d, d), dtype=bf), "wq_b": nrm((1, d)),
        "wkv_w": nrm((d, 2 * d), dtype=bf), "wkv_b": nrm((1, 2 * d)),
        "wo_w": nrm((d, d), dtype=bf), "wo_b": nrm((1, d)),
        "norm_f2_w": jnp.ones((1, d), jnp.float32),
    }
    return params


def mamba_decoder_forward(params, input_ids, encoder_output, args: ModelArgs):
    x = params["embedding"][input_ids]                       # (B, L, D) glue gather
    for lp in params["layers"]:
        x = fused_mamba_layer(x, lp, args)                   # x + MambaBlock(RMSNorm(x))
    # norm_f + cross attention + norm_f2, all fused
    return fused_attention_tail(x, encoder_output, params["attn"], args)


# ----------------------------------------------------------------------------
if __name__ == "__main__":
    args = ModelArgs(d_model=32, n_layer=2, vocab_size=64,
                     d_state=4, expand=2, d_conv=4, num_heads=4)
    key = jax.random.PRNGKey(0)
    pkey, ikey, ekey = jax.random.split(key, 3)

    params = init_params(pkey, args)

    B, Lt, Ls = 2, 8, 8
    input_ids = jax.random.randint(ikey, (B, Lt), 0, args.vocab_size)
    encoder_output = jax.random.normal(ekey, (B, Ls, args.d_model), jnp.float32)

    fwd = jax.jit(lambda p, ids, enc: mamba_decoder_forward(p, ids, enc, args))
    logits = fwd(params, input_ids, encoder_output)
    jax.block_until_ready(logits)

    assert logits.shape == (B, Lt, args.d_model)
    assert bool(jnp.all(jnp.isfinite(logits)))
    print("KERNEL_OK")
</pallas_src>

<mosaic_0001>
module attributes {stable_mosaic.version = 11 : i64} {
  func.func @_attn_tail_kernel(%arg0: i32, %arg1: memref<1x8x32xf32, #tpu.memory_space<vmem>>, %arg2: memref<1x32xf32, #tpu.memory_space<vmem>>, %arg3: memref<32x32xbf16, #tpu.memory_space<vmem>>, %arg4: memref<1x32xf32, #tpu.memory_space<vmem>>, %arg5: memref<32x64xbf16, #tpu.memory_space<vmem>>, %arg6: memref<1x64xf32, #tpu.memory_space<vmem>>, %arg7: memref<1x8x32xf32, #tpu.memory_space<vmem>>, %arg8: memref<32x32xbf16, #tpu.memory_space<vmem>>, %arg9: memref<1x32xf32, #tpu.memory_space<vmem>>, %arg10: memref<1x32xf32, #tpu.memory_space<vmem>>, %arg11: memref<1x8x32xf32, #tpu.memory_space<vmem>>) attributes {dimension_semantics = [#tpu.dimension_semantics<parallel>], iteration_bounds = array<i64: 2>, scalar_prefetch = 0 : i64, scratch_operands = 0 : i64, tpu.core_type = #tpu.core_type<tc>, window_params = [{transform_indices = @transform_0, window_bounds = array<i64: 1, 8, 32>}, {pipeline_mode = #tpu.pipeline_mode<synchronous>, transform_indices = @transform_1, window_bounds = array<i64: 1, 32>}, {pipeline_mode = #tpu.pipeline_mode<synchronous>, transform_indices = @transform_2, window_bounds = array<i64: 32, 32>}, {pipeline_mode = #tpu.pipeline_mode<synchronous>, transform_indices = @transform_3, window_bounds = array<i64: 1, 32>}, {pipeline_mode = #tpu.pipeline_mode<synchronous>, transform_indices = @transform_4, window_bounds = array<i64: 32, 64>}, {pipeline_mode = #tpu.pipeline_mode<synchronous>, transform_indices = @transform_5, window_bounds = array<i64: 1, 64>}, {transform_indices = @transform_6, window_bounds = array<i64: 1, 8, 32>}, {pipeline_mode = #tpu.pipeline_mode<synchronous>, transform_indices = @transform_7, window_bounds = array<i64: 32, 32>}, {pipeline_mode = #tpu.pipeline_mode<synchronous>, transform_indices = @transform_8, window_bounds = array<i64: 1, 32>}, {pipeline_mode = #tpu.pipeline_mode<synchronous>, transform_indices = @transform_9, window_bounds = array<i64: 1, 32>}, {transform_indices = @transform_10, window_bounds = array<i64: 1, 8, 32>}]} {
    %c0 = arith.constant 0 : index
    %c0_0 = arith.constant 0 : index
    %c0_1 = arith.constant 0 : index
    %0 = vector.load %arg1[%c0, %c0_0, %c0_1] : memref<1x8x32xf32, #tpu.memory_space<vmem>>, vector<1x8x32xf32>
    %1 = vector.shape_cast %0 : vector<1x8x32xf32> to vector<8x32xf32>
    %c0_2 = arith.constant 0 : index
    %c0_3 = arith.constant 0 : index
    %2 = vector.load %arg2[%c0_2, %c0_3] : memref<1x32xf32, #tpu.memory_space<vmem>>, vector<1x32xf32>
    %3 = arith.mulf %1, %1 : vector<8x32xf32>
    %cst = arith.constant dense<0.000000e+00> : vector<8xf32>
    %4 = vector.multi_reduction <add>, %3, %cst [1] : vector<8x32xf32> to vector<8xf32>
    %5 = vector.shape_cast %4 : vector<8xf32> to vector<8x1xf32>
    %cst_4 = arith.constant 3.200000e+01 : f32
    %6 = vector.broadcast %cst_4 : f32 to vector<8x1xf32>
    %7 = arith.divf %5, %6 : vector<8x1xf32>
    %cst_5 = arith.constant 9.99999974E-6 : f32
    %8 = vector.broadcast %cst_5 : f32 to vector<8x1xf32>
    %9 = arith.addf %7, %8 : vector<8x1xf32>
    %10 = math.rsqrt %9 : vector<8x1xf32>
    %11 = vector.broadcast %10 : vector<8x1xf32> to vector<8x32xf32>
    %12 = arith.mulf %1, %11 : vector<8x32xf32>
    %13 = vector.broadcast %2 : vector<1x32xf32> to vector<8x32xf32>
    %14 = arith.mulf %12, %13 : vector<8x32xf32>
    %15 = arith.truncf %14 : vector<8x32xf32> to vector<8x32xbf16>
    %c0_6 = arith.constant 0 : index
    %c0_7 = arith.constant 0 : index
    %16 = vector.load %arg3[%c0_6, %c0_7] : memref<32x32xbf16, #tpu.memory_space<vmem>>, vector<32x32xbf16>
    %cst_8 = arith.constant dense<0.000000e+00> : vector<8x32xf32>
    %17 = tpu.matmul %15, %16, %cst_8 {dimension_numbers = #tpu.dot_dimension_numbers<[1], [0], [0], [1], [0, 0, 1, 1], [], []>} : vector<8x32xbf16>, vector<32x32xbf16>, vector<8x32xf32> -> vector<8x32xf32>
    %c0_9 = arith.constant 0 : index
    %c0_10 = arith.constant 0 : index
    %18 = vector.load %arg4[%c0_9, %c0_10] : memref<1x32xf32, #tpu.memory_space<vmem>>, vector<1x32xf32>
    %19 = vector.broadcast %18 : vector<1x32xf32> to vector<8x32xf32>
    %20 = arith.addf %17, %19 : vector<8x32xf32>
    %21 = arith.truncf %20 : vector<8x32xf32> to vector<8x32xbf16>
    %c0_11 = arith.constant 0 : index
    %c0_12 = arith.constant 0 : index
    %c0_13 = arith.constant 0 : index
    %22 = vector.load %arg7[%c0_11, %c0_12, %c0_13] : memref<1x8x32xf32, #tpu.memory_space<vmem>>, vector<1x8x32xf32>
    %23 = vector.shape_cast %22 : vector<1x8x32xf32> to vector<8x32xf32>
    %24 = arith.truncf %23 : vector<8x32xf32> to vector<8x32xbf16>
    %c0_14 = arith.constant 0 : index
    %c0_15 = arith.constant 0 : index
    %25 = vector.load %arg5[%c0_14, %c0_15] : memref<32x64xbf16, #tpu.memory_space<vmem>>, vector<32x64xbf16>
    %cst_16 = arith.constant dense<0.000000e+00> : vector<8x64xf32>
    %26 = tpu.matmul %24, %25, %cst_16 {dimension_numbers = #tpu.dot_dimension_numbers<[1], [0], [0], [1], [0, 0, 1, 1], [], []>} : vector<8x32xbf16>, vector<32x64xbf16>, vector<8x64xf32> -> vector<8x64xf32>
    %c0_17 = arith.constant 0 : index
    %c0_18 = arith.constant 0 : index
    %27 = vector.load %arg6[%c0_17, %c0_18] : memref<1x64xf32, #tpu.memory_space<vmem>>, vector<1x64xf32>
    %28 = vector.broadcast %27 : vector<1x64xf32> to vector<8x64xf32>
    %29 = arith.addf %26, %28 : vector<8x64xf32>
    %30 = vector.extract_strided_slice %29 {offsets = [0, 0], sizes = [8, 32], strides = [1, 1]} : vector<8x64xf32> to vector<8x32xf32>
    %31 = arith.truncf %30 : vector<8x32xf32> to vector<8x32xbf16>
    %32 = vector.extract_strided_slice %29 {offsets = [0, 32], sizes = [8, 32], strides = [1, 1]} : vector<8x64xf32> to vector<8x32xf32>
    %33 = arith.truncf %32 : vector<8x32xf32> to vector<8x32xbf16>
    %34 = vector.extract_strided_slice %21 {offsets = [0, 0], sizes = [8, 8], strides = [1, 1]} : vector<8x32xbf16> to vector<8x8xbf16>
    %35 = vector.extract_strided_slice %31 {offsets = [0, 0], sizes = [8, 8], strides = [1, 1]} : vector<8x32xbf16> to vector<8x8xbf16>
    %36 = vector.extract_strided_slice %33 {offsets = [0, 0], sizes = [8, 8], strides = [1, 1]} : vector<8x32xbf16> to vector<8x8xbf16>
    %cst_19 = arith.constant dense<0.000000e+00> : vector<8x8xf32>
    %37 = tpu.matmul %34, %35, %cst_19 {dimension_numbers = #tpu.dot_dimension_numbers<[1], [1], [0], [0], [0, 0, 1, 0], [], []>} : vector<8x8xbf16>, vector<8x8xbf16>, vector<8x8xf32> -> vector<8x8xf32>
    %cst_20 = arith.constant 0.353553385 : f32
    %38 = vector.broadcast %cst_20 : f32 to vector<8x8xf32>
    %39 = arith.mulf %37, %38 : vector<8x8xf32>
    %cst_21 = arith.constant dense<0xFF800000> : vector<8xf32>
    %40 = vector.multi_reduction <maximumf>, %39, %cst_21 [1] : vector<8x8xf32> to vector<8xf32>
    %41 = vector.shape_cast %40 : vector<8xf32> to vector<8x1xf32>
    %42 = vector.broadcast %41 : vector<8x1xf32> to vector<8x8xf32>
    %43 = arith.subf %39, %42 : vector<8x8xf32>
    %44 = math.exp %43 : vector<8x8xf32>
    %cst_22 = arith.constant dense<0.000000e+00> : vector<8xf32>
    %45 = vector.multi_reduction <add>, %44, %cst_22 [1] : vector<8x8xf32> to vector<8xf32>
    %46 = vector.shape_cast %45 : vector<8xf32> to vector<8x1xf32>
    %47 = tpu.reciprocal %46 {approx = true} : vector<8x1xf32> -> vector<8x1xf32>
    %48 = vector.broadcast %47 : vector<8x1xf32> to vector<8x8xf32>
    %49 = arith.mulf %44, %48 : vector<8x8xf32>
    %50 = arith.truncf %49 : vector<8x8xf32> to vector<8x8xbf16>
    %cst_23 = arith.constant dense<0.000000e+00> : vector<8x8xf32>
    %51 = tpu.matmul %50, %36, %cst_23 {dimension_numbers = #tpu.dot_dimension_numbers<[1], [0], [0], [1], [0, 0, 1, 1], [], []>} : vector<8x8xbf16>, vector<8x8xbf16>, vector<8x8xf32> -> vector<8x8xf32>
    %52 = vector.extract_strided_slice %21 {offsets = [0, 8], sizes = [8, 8], strides = [1, 1]} : vector<8x32xbf16> to vector<8x8xbf16>
    %53 = vector.extract_strided_slice %31 {offsets = [0, 8], sizes = [8, 8], strides = [1, 1]} : vector<8x32xbf16> to vector<8x8xbf16>
    %54 = vector.extract_strided_slice %33 {offsets = [0, 8], sizes = [8, 8], strides = [1, 1]} : vector<8x32xbf16> to vector<8x8xbf16>
    %cst_24 = arith.constant dense<0.000000e+00> : vector<8x8xf32>
    %55 = tpu.matmul %52, %53, %cst_24 {dimension_numbers = #tpu.dot_dimension_numbers<[1], [1], [0], [0], [0, 0, 1, 0], [], []>} : vector<8x8xbf16>, vector<8x8xbf16>, vector<8x8xf32> -> vector<8x8xf32>
    %cst_25 = arith.constant 0.353553385 : f32
    %56 = vector.broadcast %cst_25 : f32 to vector<8x8xf32>
    %57 = arith.mulf %55, %56 : vector<8x8xf32>
    %cst_26 = arith.constant dense<0xFF800000> : vector<8xf32>
    %58 = vector.multi_reduction <maximumf>, %57, %cst_26 [1] : vector<8x8xf32> to vector<8xf32>
    %59 = vector.shape_cast %58 : vector<8xf32> to vector<8x1xf32>
    %60 = vector.broadcast %59 : vector<8x1xf32> to vector<8x8xf32>
    %61 = arith.subf %57, %60 : vector<8x8xf32>
    %62 = math.exp %61 : vector<8x8xf32>
    %cst_27 = arith.constant dense<0.000000e+00> : vector<8xf32>
    %63 = vector.multi_reduction <add>, %62, %cst_27 [1] : vector<8x8xf32> to vector<8xf32>
    %64 = vector.shape_cast %63 : vector<8xf32> to vector<8x1xf32>
    %65 = tpu.reciprocal %64 {approx = true} : vector<8x1xf32> -> vector<8x1xf32>
    %66 = vector.broadcast %65 : vector<8x1xf32> to vector<8x8xf32>
    %67 = arith.mulf %62, %66 : vector<8x8xf32>
    %68 = arith.truncf %67 : vector<8x8xf32> to vector<8x8xbf16>
    %cst_28 = arith.constant dense<0.000000e+00> : vector<8x8xf32>
    %69 = tpu.matmul %68, %54, %cst_28 {dimension_numbers = #tpu.dot_dimension_numbers<[1], [0], [0], [1], [0, 0, 1, 1], [], []>} : vector<8x8xbf16>, vector<8x8xbf16>, vector<8x8xf32> -> vector<8x8xf32>
    %70 = vector.extract_strided_slice %21 {offsets = [0, 16], sizes = [8, 8], strides = [1, 1]} : vector<8x32xbf16> to vector<8x8xbf16>
    %71 = vector.extract_strided_slice %31 {offsets = [0, 16], sizes = [8, 8], strides = [1, 1]} : vector<8x32xbf16> to vector<8x8xbf16>
    %72 = vector.extract_strided_slice %33 {offsets = [0, 16], sizes = [8, 8], strides = [1, 1]} : vector<8x32xbf16> to vector<8x8xbf16>
    %cst_29 = arith.constant dense<0.000000e+00> : vector<8x8xf32>
    %73 = tpu.matmul %70, %71, %cst_29 {dimension_numbers = #tpu.dot_dimension_numbers<[1], [1], [0], [0], [0, 0, 1, 0], [], []>} : vector<8x8xbf16>, vector<8x8xbf16>, vector<8x8xf32> -> vector<8x8xf32>
    %cst_30 = arith.constant 0.353553385 : f32
    %74 = vector.broadcast %cst_30 : f32 to vector<8x8xf32>
    %75 = arith.mulf %73, %74 : vector<8x8xf32>
    %cst_31 = arith.constant dense<0xFF800000> : vector<8xf32>
    %76 = vector.multi_reduction <maximumf>, %75, %cst_31 [1] : vector<8x8xf32> to vector<8xf32>
    %77 = vector.shape_cast %76 : vector<8xf32> to vector<8x1xf32>
    %78 = vector.broadcast %77 : vector<8x1xf32> to vector<8x8xf32>
    %79 = arith.subf %75, %78 : vector<8x8xf32>
    %80 = math.exp %79 : vector<8x8xf32>
    %cst_32 = arith.constant dense<0.000000e+00> : vector<8xf32>
    %81 = vector.multi_reduction <add>, %80, %cst_32 [1] : vector<8x8xf32> to vector<8xf32>
    %82 = vector.shape_cast %81 : vector<8xf32> to vector<8x1xf32>
    %83 = tpu.reciprocal %82 {approx = true} : vector<8x1xf32> -> vector<8x1xf32>
    %84 = vector.broadcast %83 : vector<8x1xf32> to vector<8x8xf32>
    %85 = arith.mulf %80, %84 : vector<8x8xf32>
    %86 = arith.truncf %85 : vector<8x8xf32> to vector<8x8xbf16>
    %cst_33 = arith.constant dense<0.000000e+00> : vector<8x8xf32>
    %87 = tpu.matmul %86, %72, %cst_33 {dimension_numbers = #tpu.dot_dimension_numbers<[1], [0], [0], [1], [0, 0, 1, 1], [], []>} : vector<8x8xbf16>, vector<8x8xbf16>, vector<8x8xf32> -> vector<8x8xf32>
    %88 = vector.extract_strided_slice %21 {offsets = [0, 24], sizes = [8, 8], strides = [1, 1]} : vector<8x32xbf16> to vector<8x8xbf16>
    %89 = vector.extract_strided_slice %31 {offsets = [0, 24], sizes = [8, 8], strides = [1, 1]} : vector<8x32xbf16> to vector<8x8xbf16>
    %90 = vector.extract_strided_slice %33 {offsets = [0, 24], sizes = [8, 8], strides = [1, 1]} : vector<8x32xbf16> to vector<8x8xbf16>
    %cst_34 = arith.constant dense<0.000000e+00> : vector<8x8xf32>
    %91 = tpu.matmul %88, %89, %cst_34 {dimension_numbers = #tpu.dot_dimension_numbers<[1], [1], [0], [0], [0, 0, 1, 0], [], []>} : vector<8x8xbf16>, vector<8x8xbf16>, vector<8x8xf32> -> vector<8x8xf32>
    %cst_35 = arith.constant 0.353553385 : f32
    %92 = vector.broadcast %cst_35 : f32 to vector<8x8xf32>
    %93 = arith.mulf %91, %92 : vector<8x8xf32>
    %cst_36 = arith.constant dense<0xFF800000> : vector<8xf32>
    %94 = vector.multi_reduction <maximumf>, %93, %cst_36 [1] : vector<8x8xf32> to vector<8xf32>
    %95 = vector.shape_cast %94 : vector<8xf32> to vector<8x1xf32>
    %96 = vector.broadcast %95 : vector<8x1xf32> to vector<8x8xf32>
    %97 = arith.subf %93, %96 : vector<8x8xf32>
    %98 = math.exp %97 : vector<8x8xf32>
    %cst_37 = arith.constant dense<0.000000e+00> : vector<8xf32>
    %99 = vector.multi_reduction <add>, %98, %cst_37 [1] : vector<8x8xf32> to vector<8xf32>
    %100 = vector.shape_cast %99 : vector<8xf32> to vector<8x1xf32>
    %101 = tpu.reciprocal %100 {approx = true} : vector<8x1xf32> -> vector<8x1xf32>
    %102 = vector.broadcast %101 : vector<8x1xf32> to vector<8x8xf32>
    %103 = arith.mulf %98, %102 : vector<8x8xf32>
    %104 = arith.truncf %103 : vector<8x8xf32> to vector<8x8xbf16>
    %cst_38 = arith.constant dense<0.000000e+00> : vector<8x8xf32>
    %105 = tpu.matmul %104, %90, %cst_38 {dimension_numbers = #tpu.dot_dimension_numbers<[1], [0], [0], [1], [0, 0, 1, 1], [], []>} : vector<8x8xbf16>, vector<8x8xbf16>, vector<8x8xf32> -> vector<8x8xf32>
    %106 = tpu.concatenate %51, %69, %87, %105 in 1 : vector<8x8xf32>, vector<8x8xf32>, vector<8x8xf32>, vector<8x8xf32> -> vector<8x32xf32>
    %107 = arith.truncf %106 : vector<8x32xf32> to vector<8x32xbf16>
    %c0_39 = arith.constant 0 : index
    %c0_40 = arith.constant 0 : index
    %108 = vector.load %arg8[%c0_39, %c0_40] : memref<32x32xbf16, #tpu.memory_space<vmem>>, vector<32x32xbf16>
    %cst_41 = arith.constant dense<0.000000e+00> : vector<8x32xf32>
    %109 = tpu.matmul %107, %108, %cst_41 {dimension_numbers = #tpu.dot_dimension_numbers<[1], [0], [0], [1], [0, 0, 1, 1], [], []>} : vector<8x32xbf16>, vector<32x32xbf16>, vector<8x32xf32> -> vector<8x32xf32>
    %c0_42 = arith.constant 0 : index
    %c0_43 = arith.constant 0 : index
    %110 = vector.load %arg9[%c0_42, %c0_43] : memref<1x32xf32, #tpu.memory_space<vmem>>, vector<1x32xf32>
    %111 = vector.broadcast %110 : vector<1x32xf32> to vector<8x32xf32>
    %112 = arith.addf %109, %111 : vector<8x32xf32>
    %c0_44 = arith.constant 0 : index
    %c0_45 = arith.constant 0 : index
    %113 = vector.load %arg10[%c0_44, %c0_45] : memref<1x32xf32, #tpu.memory_space<vmem>>, vector<1x32xf32>
    %114 = arith.mulf %112, %112 : vector<8x32xf32>
    %cst_46 = arith.constant dense<0.000000e+00> : vector<8xf32>
    %115 = vector.multi_reduction <add>, %114, %cst_46 [1] : vector<8x32xf32> to vector<8xf32>
    %116 = vector.shape_cast %115 : vector<8xf32> to vector<8x1xf32>
    %cst_47 = arith.constant 3.200000e+01 : f32
    %117 = vector.broadcast %cst_47 : f32 to vector<8x1xf32>
    %118 = arith.divf %116, %117 : vector<8x1xf32>
    %cst_48 = arith.constant 9.99999974E-6 : f32
    %119 = vector.broadcast %cst_48 : f32 to vector<8x1xf32>
    %120 = arith.addf %118, %119 : vector<8x1xf32>
    %121 = math.rsqrt %120 : vector<8x1xf32>
    %122 = vector.broadcast %121 : vector<8x1xf32> to vector<8x32xf32>
    %123 = arith.mulf %112, %122 : vector<8x32xf32>
    %124 = vector.broadcast %113 : vector<1x32xf32> to vector<8x32xf32>
    %125 = arith.mulf %123, %124 : vector<8x32xf32>
    %c0_49 = arith.constant 0 : index
    %c0_50 = arith.constant 0 : index
    %c0_51 = arith.constant 0 : index
    %126 = vector.load %arg11[%c0_49, %c0_50, %c0_51] : memref<1x8x32xf32, #tpu.memory_space<vmem>>, vector<1x8x32xf32>
    %127 = vector.shape_cast %126 : vector<1x8x32xf32> to vector<8x32xf32>
    %128 = vector.shape_cast %125 : vector<8x32xf32> to vector<1x8x32xf32>
    tpu.vector_store %arg11[%c0_49, %c0_50, %c0_51], %128 {strides = array<i32>} : memref<1x8x32xf32, #tpu.memory_space<vmem>>, vector<1x8x32xf32>,
    return
  }
  func.func @transform_0(%arg0: i32) -> (i32, i32, i32) {
    %c0_i32 = arith.constant 0 : i32
    %c0_i32_0 = arith.constant 0 : i32
    %c0_i32_1 = arith.constant 0 : i32
    return %arg0, %c0_i32, %c0_i32_0 : i32, i32, i32
  }
  func.func @transform_1(%arg0: i32) -> (i32, i32) {
    %c0_i32 = arith.constant 0 : i32
    %c0_i32_0 = arith.constant 0 : i32
    %c0_i32_1 = arith.constant 0 : i32
    return %c0_i32, %c0_i32_0 : i32, i32
  }
  func.func @transform_2(%arg0: i32) -> (i32, i32) {
    %c0_i32 = arith.constant 0 : i32
    %c0_i32_0 = arith.constant 0 : i32
    %c0_i32_1 = arith.constant 0 : i32
    return %c0_i32, %c0_i32_0 : i32, i32
  }
  func.func @transform_3(%arg0: i32) -> (i32, i32) {
    %c0_i32 = arith.constant 0 : i32
    %c0_i32_0 = arith.constant 0 : i32
    %c0_i32_1 = arith.constant 0 : i32
    return %c0_i32, %c0_i32_0 : i32, i32
  }
  func.func @transform_4(%arg0: i32) -> (i32, i32) {
    %c0_i32 = arith.constant 0 : i32
    %c0_i32_0 = arith.constant 0 : i32
    %c0_i32_1 = arith.constant 0 : i32
    return %c0_i32, %c0_i32_0 : i32, i32
  }
  func.func @transform_5(%arg0: i32) -> (i32, i32) {
    %c0_i32 = arith.constant 0 : i32
    %c0_i32_0 = arith.constant 0 : i32
    %c0_i32_1 = arith.constant 0 : i32
    return %c0_i32, %c0_i32_0 : i32, i32
  }
  func.func @transform_6(%arg0: i32) -> (i32, i32, i32) {
    %c0_i32 = arith.constant 0 : i32
    %c0_i32_0 = arith.constant 0 : i32
    %c0_i32_1 = arith.constant 0 : i32
    return %arg0, %c0_i32, %c0_i32_0 : i32, i32, i32
  }
  func.func @transform_7(%arg0: i32) -> (i32, i32) {
    %c0_i32 = arith.constant 0 : i32
    %c0_i32_0 = arith.constant 0 : i32
    %c0_i32_1 = arith.constant 0 : i32
    return %c0_i32, %c0_i32_0 : i32, i32
  }
  func.func @transform_8(%arg0: i32) -> (i32, i32) {
    %c0_i32 = arith.constant 0 : i32
    %c0_i32_0 = arith.constant 0 : i32
    %c0_i32_1 = arith.constant 0 : i32
    return %c0_i32, %c0_i32_0 : i32, i32
  }
  func.func @transform_9(%arg0: i32) -> (i32, i32) {
    %c0_i32 = arith.constant 0 : i32
    %c0_i32_0 = arith.constant 0 : i32
    %c0_i32_1 = arith.constant 0 : i32
    return %c0_i32, %c0_i32_0 : i32, i32
  }
  func.func @transform_10(%arg0: i32) -> (i32, i32, i32) {
    %c0_i32 = arith.constant 0 : i32
    %c0_i32_0 = arith.constant 0 : i32
    %c0_i32_1 = arith.constant 0 : i32
    return %arg0, %c0_i32, %c0_i32_0 : i32, i32, i32
  }
}

module attributes {stable_mosaic.version = 11 : i64} {
  func.func @_mamba_layer_kernel(%arg0: i32, %arg1: memref<1x8x32xf32, #tpu.memory_space<vmem>>, %arg2: memref<1x32xf32, #tpu.memory_space<vmem>>, %arg3: memref<32x128xbf16, #tpu.memory_space<vmem>>, %arg4: memref<4x64xf32, #tpu.memory_space<vmem>>, %arg5: memref<1x64xf32, #tpu.memory_space<vmem>>, %arg6: memref<64x10xbf16, #tpu.memory_space<vmem>>, %arg7: memref<2x64xbf16, #tpu.memory_space<vmem>>, %arg8: memref<1x64xf32, #tpu.memory_space<vmem>>, %arg9: memref<1x256xf32, #tpu.memory_space<vmem>>, %arg10: memref<1x64xf32, #tpu.memory_space<vmem>>, %arg11: memref<64x32xbf16, #tpu.memory_space<vmem>>, %arg12: memref<1x8x32xf32, #tpu.memory_space<vmem>>) attributes {dimension_semantics = [#tpu.dimension_semantics<parallel>], iteration_bounds = array<i64: 2>, scalar_prefetch = 0 : i64, scratch_operands = 0 : i64, tpu.core_type = #tpu.core_type<tc>, window_params = [{transform_indices = @transform_0, window_bounds = array<i64: 1, 8, 32>}, {pipeline_mode = #tpu.pipeline_mode<synchronous>, transform_indices = @transform_1, window_bounds = array<i64: 1, 32>}, {pipeline_mode = #tpu.pipeline_mode<synchronous>, transform_indices = @transform_2, window_bounds = array<i64: 32, 128>}, {pipeline_mode = #tpu.pipeline_mode<synchronous>, transform_indices = @transform_3, window_bounds = array<i64: 4, 64>}, {pipeline_mode = #tpu.pipeline_mode<synchronous>, transform_indices = @transform_4, window_bounds = array<i64: 1, 64>}, {pipeline_mode = #tpu.pipeline_mode<synchronous>, transform_indices = @transform_5, window_bounds = array<i64: 64, 10>}, {pipeline_mode = #tpu.pipeline_mode<synchronous>, transform_indices = @transform_6, window_bounds = array<i64: 2, 64>}, {pipeline_mode = #tpu.pipeline_mode<synchronous>, transform_indices = @transform_7, window_bounds = array<i64: 1, 64>}, {pipeline_mode = #tpu.pipeline_mode<synchronous>, transform_indices = @transform_8, window_bounds = array<i64: 1, 256>}, {pipeline_mode = #tpu.pipeline_mode<synchronous>, transform_indices = @transform_9, window_bounds = array<i64: 1, 64>}, {pipeline_mode = #tpu.pipeline_mode<synchronous>, transform_indices = @transform_10, window_bounds = array<i64: 64, 32>}, {transform_indices = @transform_11, window_bounds = array<i64: 1, 8, 32>}]} {
    %c0 = arith.constant 0 : index
    %c0_0 = arith.constant 0 : index
    %c0_1 = arith.constant 0 : index
    %0 = vector.load %arg1[%c0, %c0_0, %c0_1] : memref<1x8x32xf32, #tpu.memory_space<vmem>>, vector<1x8x32xf32>
    %1 = vector.shape_cast %0 : vector<1x8x32xf32> to vector<8x32xf32>
    %c0_2 = arith.constant 0 : index
    %c0_3 = arith.constant 0 : index
    %2 = vector.load %arg2[%c0_2, %c0_3] : memref<1x32xf32, #tpu.memory_space<vmem>>, vector<1x32xf32>
    %3 = arith.mulf %1, %1 : vector<8x32xf32>
    %cst = arith.constant dense<0.000000e+00> : vector<8xf32>
    %4 = vector.multi_reduction <add>, %3, %cst [1] : vector<8x32xf32> to vector<8xf32>
    %5 = vector.shape_cast %4 : vector<8xf32> to vector<8x1xf32>
    %cst_4 = arith.constant 3.200000e+01 : f32
    %6 = vector.broadcast %cst_4 : f32 to vector<8x1xf32>
    %7 = arith.divf %5, %6 : vector<8x1xf32>
    %cst_5 = arith.constant 9.99999974E-6 : f32
    %8 = vector.broadcast %cst_5 : f32 to vector<8x1xf32>
    %9 = arith.addf %7, %8 : vector<8x1xf32>
    %10 = math.rsqrt %9 : vector<8x1xf32>
    %11 = vector.broadcast %10 : vector<8x1xf32> to vector<8x32xf32>
    %12 = arith.mulf %1, %11 : vector<8x32xf32>
    %13 = vector.broadcast %2 : vector<1x32xf32> to vector<8x32xf32>
    %14 = arith.mulf %12, %13 : vector<8x32xf32>
    %15 = arith.truncf %14 : vector<8x32xf32> to vector<8x32xbf16>
    %c0_6 = arith.constant 0 : index
    %c0_7 = arith.constant 0 : index
    %16 = vector.load %arg3[%c0_6, %c0_7] : memref<32x128xbf16, #tpu.memory_space<vmem>>, vector<32x128xbf16>
    %cst_8 = arith.constant dense<0.000000e+00> : vector<8x128xf32>
    %17 = tpu.matmul %15, %16, %cst_8 {dimension_numbers = #tpu.dot_dimension_numbers<[1], [0], [0], [1], [0, 0, 1, 1], [], []>} : vector<8x32xbf16>, vector<32x128xbf16>, vector<8x128xf32> -> vector<8x128xf32>
    %18 = vector.extract_strided_slice %17 {offsets = [0, 0], sizes = [8, 64], strides = [1, 1]} : vector<8x128xf32> to vector<8x64xf32>
    %19 = vector.extract_strided_slice %17 {offsets = [0, 64], sizes = [8, 64], strides = [1, 1]} : vector<8x128xf32> to vector<8x64xf32>
    %c0_9 = arith.constant 0 : index
    %c0_10 = arith.constant 0 : index
    %20 = vector.load %arg4[%c0_9, %c0_10] : memref<4x64xf32, #tpu.memory_space<vmem>>, vector<4x64xf32>
    %21 = vector.extract_strided_slice %20 {offsets = [3, 0], sizes = [1, 64], strides = [1, 1]} : vector<4x64xf32> to vector<1x64xf32>
    %22 = vector.broadcast %21 : vector<1x64xf32> to vector<8x64xf32>
    %23 = arith.mulf %18, %22 : vector<8x64xf32>
    %cst_11 = arith.constant 0.000000e+00 : f32
    %24 = vector.broadcast %cst_11 : f32 to vector<3x64xf32>
    %25 = vector.extract_strided_slice %18 {offsets = [0, 0], sizes = [5, 64], strides = [1, 1]} : vector<8x64xf32> to vector<5x64xf32>
    %26 = tpu.concatenate %24, %25 in 0 : vector<3x64xf32>, vector<5x64xf32> -> vector<8x64xf32>
    %27 = vector.extract_strided_slice %20 {offsets = [0, 0], sizes = [1, 64], strides = [1, 1]} : vector<4x64xf32> to vector<1x64xf32>
    %28 = vector.broadcast %27 : vector<1x64xf32> to vector<8x64xf32>
    %29 = arith.mulf %26, %28 : vector<8x64xf32>
    %30 = arith.addf %23, %29 : vector<8x64xf32>
    %cst_12 = arith.constant 0.000000e+00 : f32
    %31 = vector.broadcast %cst_12 : f32 to vector<2x64xf32>
    %32 = vector.extract_strided_slice %18 {offsets = [0, 0], sizes = [6, 64], strides = [1, 1]} : vector<8x64xf32> to vector<6x64xf32>
    %33 = tpu.concatenate %31, %32 in 0 : vector<2x64xf32>, vector<6x64xf32> -> vector<8x64xf32>
    %34 = vector.extract_strided_slice %20 {offsets = [1, 0], sizes = [1, 64], strides = [1, 1]} : vector<4x64xf32> to vector<1x64xf32>
    %35 = vector.broadcast %34 : vector<1x64xf32> to vector<8x64xf32>
    %36 = arith.mulf %33, %35 : vector<8x64xf32>
    %37 = arith.addf %30, %36 : vector<8x64xf32>
    %cst_13 = arith.constant 0.000000e+00 : f32
    %38 = vector.broadcast %cst_13 : f32 to vector<1x64xf32>
    %39 = vector.extract_strided_slice %18 {offsets = [0, 0], sizes = [7, 64], strides = [1, 1]} : vector<8x64xf32> to vector<7x64xf32>
    %40 = tpu.concatenate %38, %39 in 0 : vector<1x64xf32>, vector<7x64xf32> -> vector<8x64xf32>
    %41 = vector.extract_strided_slice %20 {offsets = [2, 0], sizes = [1, 64], strides = [1, 1]} : vector<4x64xf32> to vector<1x64xf32>
    %42 = vector.broadcast %41 : vector<1x64xf32> to vector<8x64xf32>
    %43 = arith.mulf %40, %42 : vector<8x64xf32>
    %44 = arith.addf %37, %43 : vector<8x64xf32>
    %c0_14 = arith.constant 0 : index
    %c0_15 = arith.constant 0 : index
    %45 = vector.load %arg5[%c0_14, %c0_15] : memref<1x64xf32, #tpu.memory_space<vmem>>, vector<1x64xf32>
    %46 = vector.broadcast %45 : vector<1x64xf32> to vector<8x64xf32>
    %47 = arith.addf %44, %46 : vector<8x64xf32>
    %cst_16 = arith.constant 0.000000e+00 : f32
    %48 = vector.broadcast %cst_16 : f32 to vector<8x64xf32>
    %49 = arith.subf %48, %47 : vector<8x64xf32>
    %50 = math.exp %49 : vector<8x64xf32>
    %cst_17 = arith.constant 1.000000e+00 : f32
    %51 = vector.broadcast %cst_17 : f32 to vector<8x64xf32>
    %52 = arith.addf %51, %50 : vector<8x64xf32>
    %53 = tpu.reciprocal %52 {approx = true} : vector<8x64xf32> -> vector<8x64xf32>
    %54 = arith.mulf %47, %53 : vector<8x64xf32>
    %55 = arith.truncf %54 : vector<8x64xf32> to vector<8x64xbf16>
    %c0_18 = arith.constant 0 : index
    %c0_19 = arith.constant 0 : index
    %56 = vector.load %arg6[%c0_18, %c0_19] : memref<64x10xbf16, #tpu.memory_space<vmem>>, vector<64x10xbf16>
    %cst_20 = arith.constant dense<0.000000e+00> : vector<8x10xf32>
    %57 = tpu.matmul %55, %56, %cst_20 {dimension_numbers = #tpu.dot_dimension_numbers<[1], [0], [0], [1], [0, 0, 1, 1], [], []>} : vector<8x64xbf16>, vector<64x10xbf16>, vector<8x10xf32> -> vector<8x10xf32>
    %58 = vector.extract_strided_slice %57 {offsets = [0, 0], sizes = [8, 2], strides = [1, 1]} : vector<8x10xf32> to vector<8x2xf32>
    %59 = vector.extract_strided_slice %57 {offsets = [0, 2], sizes = [8, 4], strides = [1, 1]} : vector<8x10xf32> to vector<8x4xf32>
    %60 = vector.extract_strided_slice %57 {offsets = [0, 6], sizes = [8, 4], strides = [1, 1]} : vector<8x10xf32> to vector<8x4xf32>
    %61 = arith.truncf %58 : vector<8x2xf32> to vector<8x2xbf16>
    %c0_21 = arith.constant 0 : index
    %c0_22 = arith.constant 0 : index
    %62 = vector.load %arg7[%c0_21, %c0_22] : memref<2x64xbf16, #tpu.memory_space<vmem>>, vector<2x64xbf16>
    %cst_23 = arith.constant dense<0.000000e+00> : vector<8x64xf32>
    %63 = tpu.matmul %61, %62, %cst_23 {dimension_numbers = #tpu.dot_dimension_numbers<[1], [0], [0], [1], [0, 0, 1, 1], [], []>} : vector<8x2xbf16>, vector<2x64xbf16>, vector<8x64xf32> -> vector<8x64xf32>
    %c0_24 = arith.constant 0 : index
    %c0_25 = arith.constant 0 : index
    %64 = vector.load %arg8[%c0_24, %c0_25] : memref<1x64xf32, #tpu.memory_space<vmem>>, vector<1x64xf32>
    %65 = vector.broadcast %64 : vector<1x64xf32> to vector<8x64xf32>
    %66 = arith.addf %63, %65 : vector<8x64xf32>
    %cst_26 = arith.constant 2.000000e+01 : f32
    %67 = vector.broadcast %cst_26 : f32 to vector<8x64xf32>
    %68 = arith.minimumf %66, %67 : vector<8x64xf32>
    %69 = math.exp %68 : vector<8x64xf32>
    %cst_27 = arith.constant 1.000000e+00 : f32
    %70 = vector.broadcast %cst_27 : f32 to vector<8x64xf32>
    %71 = arith.addf %70, %69 : vector<8x64xf32>
    %72 = math.log %71 : vector<8x64xf32>
    %cst_28 = arith.constant 2.000000e+01 : f32
    %73 = vector.broadcast %cst_28 : f32 to vector<8x64xf32>
    %74 = arith.cmpf ogt, %66, %73 : vector<8x64xf32>
    %75 = arith.select %74, %66, %72 : vector<8x64xi1>, vector<8x64xf32>
    %76 = tpu.concatenate %75, %75, %75, %75 in 1 : vector<8x64xf32>, vector<8x64xf32>, vector<8x64xf32>, vector<8x64xf32> -> vector<8x256xf32>
    %77 = tpu.concatenate %54, %54, %54, %54 in 1 : vector<8x64xf32>, vector<8x64xf32>, vector<8x64xf32>, vector<8x64xf32> -> vector<8x256xf32>
    %78 = vector.extract_strided_slice %59 {offsets = [0, 0], sizes = [8, 1], strides = [1, 1]} : vector<8x4xf32> to vector<8x1xf32>
    %79 = vector.shape_cast %78 : vector<8x1xf32> to vector<8x1xf32>
    %80 = vector.broadcast %79 : vector<8x1xf32> to vector<8x64xf32>
    %81 = vector.extract_strided_slice %59 {offsets = [0, 1], sizes = [8, 1], strides = [1, 1]} : vector<8x4xf32> to vector<8x1xf32>
    %82 = vector.shape_cast %81 : vector<8x1xf32> to vector<8x1xf32>
    %83 = vector.broadcast %82 : vector<8x1xf32> to vector<8x64xf32>
    %84 = vector.extract_strided_slice %59 {offsets = [0, 2], sizes = [8, 1], strides = [1, 1]} : vector<8x4xf32> to vector<8x1xf32>
    %85 = vector.shape_cast %84 : vector<8x1xf32> to vector<8x1xf32>
    %86 = vector.broadcast %85 : vector<8x1xf32> to vector<8x64xf32>
    %87 = vector.extract_strided_slice %59 {offsets = [0, 3], sizes = [8, 1], strides = [1, 1]} : vector<8x4xf32> to vector<8x1xf32>
    %88 = vector.shape_cast %87 : vector<8x1xf32> to vector<8x1xf32>
    %89 = vector.broadcast %88 : vector<8x1xf32> to vector<8x64xf32>
    %90 = tpu.concatenate %80, %83, %86, %89 in 1 : vector<8x64xf32>, vector<8x64xf32>, vector<8x64xf32>, vector<8x64xf32> -> vector<8x256xf32>
    %91 = vector.extract_strided_slice %60 {offsets = [0, 0], sizes = [8, 1], strides = [1, 1]} : vector<8x4xf32> to vector<8x1xf32>
    %92 = vector.shape_cast %91 : vector<8x1xf32> to vector<8x1xf32>
    %93 = vector.broadcast %92 : vector<8x1xf32> to vector<8x64xf32>
    %94 = vector.extract_strided_slice %60 {offsets = [0, 1], sizes = [8, 1], strides = [1, 1]} : vector<8x4xf32> to vector<8x1xf32>
    %95 = vector.shape_cast %94 : vector<8x1xf32> to vector<8x1xf32>
    %96 = vector.broadcast %95 : vector<8x1xf32> to vector<8x64xf32>
    %97 = vector.extract_strided_slice %60 {offsets = [0, 2], sizes = [8, 1], strides = [1, 1]} : vector<8x4xf32> to vector<8x1xf32>
    %98 = vector.shape_cast %97 : vector<8x1xf32> to vector<8x1xf32>
    %99 = vector.broadcast %98 : vector<8x1xf32> to vector<8x64xf32>
    %100 = vector.extract_strided_slice %60 {offsets = [0, 3], sizes = [8, 1], strides = [1, 1]} : vector<8x4xf32> to vector<8x1xf32>
    %101 = vector.shape_cast %100 : vector<8x1xf32> to vector<8x1xf32>
    %102 = vector.broadcast %101 : vector<8x1xf32> to vector<8x64xf32>
    %103 = tpu.concatenate %93, %96, %99, %102 in 1 : vector<8x64xf32>, vector<8x64xf32>, vector<8x64xf32>, vector<8x64xf32> -> vector<8x256xf32>
    %c0_29 = arith.constant 0 : index
    %c0_30 = arith.constant 0 : index
    %104 = vector.load %arg9[%c0_29, %c0_30] : memref<1x256xf32, #tpu.memory_space<vmem>>, vector<1x256xf32>
    %105 = vector.broadcast %104 : vector<1x256xf32> to vector<8x256xf32>
    %106 = arith.mulf %76, %105 : vector<8x256xf32>
    %107 = math.exp %106 : vector<8x256xf32>
    %108 = arith.mulf %76, %90 : vector<8x256xf32>
    %109 = arith.mulf %108, %77 : vector<8x256xf32>
    %c0_31 = arith.constant 0 : index
    %c0_32 = arith.constant 0 : index
    %110 = vector.load %arg10[%c0_31, %c0_32] : memref<1x64xf32, #tpu.memory_space<vmem>>, vector<1x64xf32>
    %111 = vector.broadcast %110 : vector<1x64xf32> to vector<8x64xf32>
    %112 = arith.mulf %54, %111 : vector<8x64xf32>
    %cst_33 = arith.constant 0.000000e+00 : f32
    %113 = vector.broadcast %cst_33 : f32 to vector<1x256xf32>
    %114 = vector.extract_strided_slice %107 {offsets = [0, 0], sizes = [1, 256], strides = [1, 1]} : vector<8x256xf32> to vector<1x256xf32>
    %115 = arith.mulf %114, %113 : vector<1x256xf32>
    %116 = vector.extract_strided_slice %109 {offsets = [0, 0], sizes = [1, 256], strides = [1, 1]} : vector<8x256xf32> to vector<1x256xf32>
    %117 = arith.addf %115, %116 : vector<1x256xf32>
    %118 = vector.extract_strided_slice %103 {offsets = [0, 0], sizes = [1, 256], strides = [1, 1]} : vector<8x256xf32> to vector<1x256xf32>
    %119 = arith.mulf %117, %118 : vector<1x256xf32>
    %120 = vector.extract_strided_slice %112 {offsets = [0, 0], sizes = [1, 64], strides = [1, 1]} : vector<8x64xf32> to vector<1x64xf32>
    %121 = vector.extract_strided_slice %119 {offsets = [0, 0], sizes = [1, 64], strides = [1, 1]} : vector<1x256xf32> to vector<1x64xf32>
    %122 = arith.addf %120, %121 : vector<1x64xf32>
    %123 = vector.extract_strided_slice %119 {offsets = [0, 64], sizes = [1, 64], strides = [1, 1]} : vector<1x256xf32> to vector<1x64xf32>
    %124 = arith.addf %122, %123 : vector<1x64xf32>
    %125 = vector.extract_strided_slice %119 {offsets = [0, 128], sizes = [1, 64], strides = [1, 1]} : vector<1x256xf32> to vector<1x64xf32>
    %126 = arith.addf %124, %125 : vector<1x64xf32>
    %127 = vector.extract_strided_slice %119 {offsets = [0, 192], sizes = [1, 64], strides = [1, 1]} : vector<1x256xf32> to vector<1x64xf32>
    %128 = arith.addf %126, %127 : vector<1x64xf32>
    %129 = vector.extract_strided_slice %107 {offsets = [1, 0], sizes = [1, 256], strides = [1, 1]} : vector<8x256xf32> to vector<1x256xf32>
    %130 = arith.mulf %129, %117 : vector<1x256xf32>
    %131 = vector.extract_strided_slice %109 {offsets = [1, 0], sizes = [1, 256], strides = [1, 1]} : vector<8x256xf32> to vector<1x256xf32>
    %132 = arith.addf %130, %131 : vector<1x256xf32>
    %133 = vector.extract_strided_slice %103 {offsets = [1, 0], sizes = [1, 256], strides = [1, 1]} : vector<8x256xf32> to vector<1x256xf32>
    %134 = arith.mulf %132, %133 : vector<1x256xf32>
    %135 = vector.extract_strided_slice %112 {offsets = [1, 0], sizes = [1, 64], strides = [1, 1]} : vector<8x64xf32> to vector<1x64xf32>
    %136 = vector.extract_strided_slice %134 {offsets = [0, 0], sizes = [1, 64], strides = [1, 1]} : vector<1x256xf32> to vector<1x64xf32>
    %137 = arith.addf %135, %136 : vector<1x64xf32>
    %138 = vector.extract_strided_slice %134 {offsets = [0, 64], sizes = [1, 64], strides = [1, 1]} : vector<1x256xf32> to vector<1x64xf32>
    %139 = arith.addf %137, %138 : vector<1x64xf32>
    %140 = vector.extract_strided_slice %134 {offsets = [0, 128], sizes = [1, 64], strides = [1, 1]} : vector<1x256xf32> to vector<1x64xf32>
    %141 = arith.addf %139, %140 : vector<1x64xf32>
    %142 = vector.extract_strided_slice %134 {offsets = [0, 192], sizes = [1, 64], strides = [1, 1]} : vector<1x256xf32> to vector<1x64xf32>
    %143 = arith.addf %141, %142 : vector<1x64xf32>
    %144 = vector.extract_strided_slice %107 {offsets = [2, 0], sizes = [1, 256], strides = [1, 1]} : vector<8x256xf32> to vector<1x256xf32>
    %145 = arith.mulf %144, %132 : vector<1x256xf32>
    %146 = vector.extract_strided_slice %109 {offsets = [2, 0], sizes = [1, 256], strides = [1, 1]} : vector<8x256xf32> to vector<1x256xf32>
    %147 = arith.addf %145, %146 : vector<1x256xf32>
    %148 = vector.extract_strided_slice %103 {offsets = [2, 0], sizes = [1, 256], strides = [1, 1]} : vector<8x256xf32> to vector<1x256xf32>
    %149 = arith.mulf %147, %148 : vector<1x256xf32>
    %150 = vector.extract_strided_slice %112 {offsets = [2, 0], sizes = [1, 64], strides = [1, 1]} : vector<8x64xf32> to vector<1x64xf32>
    %151 = vector.extract_strided_slice %149 {offsets = [0, 0], sizes = [1, 64], strides = [1, 1]} : vector<1x256xf32> to vector<1x64xf32>
    %152 = arith.addf %150, %151 : vector<1x64xf32>
    %153 = vector.extract_strided_slice %149 {offsets = [0, 64], sizes = [1, 64], strides = [1, 1]} : vector<1x256xf32> to vector<1x64xf32>
    %154 = arith.addf %152, %153 : vector<1x64xf32>
    %155 = vector.extract_strided_slice %149 {offsets = [0, 128], sizes = [1, 64], strides = [1, 1]} : vector<1x256xf32> to vector<1x64xf32>
    %156 = arith.addf %154, %155 : vector<1x64xf32>
    %157 = vector.extract_strided_slice %149 {offsets = [0, 192], sizes = [1, 64], strides = [1, 1]} : vector<1x256xf32> to vector<1x64xf32>
    %158 = arith.addf %156, %157 : vector<1x64xf32>
    %159 = vector.extract_strided_slice %107 {offsets = [3, 0], sizes = [1, 256], strides = [1, 1]} : vector<8x256xf32> to vector<1x256xf32>
    %160 = arith.mulf %159, %147 : vector<1x256xf32>
    %161 = vector.extract_strided_slice %109 {offsets = [3, 0], sizes = [1, 256], strides = [1, 1]} : vector<8x256xf32> to vector<1x256xf32>
    %162 = arith.addf %160, %161 : vector<1x256xf32>
    %163 = vector.extract_strided_slice %103 {offsets = [3, 0], sizes = [1, 256], strides = [1, 1]} : vector<8x256xf32> to vector<1x256xf32>
    %164 = arith.mulf %162, %163 : vector<1x256xf32>
    %165 = vector.extract_strided_slice %112 {offsets = [3, 0], sizes = [1, 64], strides = [1, 1]} : vector<8x64xf32> to vector<1x64xf32>
    %166 = vector.extract_strided_slice %164 {offsets = [0, 0], sizes = [1, 64], strides = [1, 1]} : vector<1x256xf32> to vector<1x64xf32>
    %167 = arith.addf %165, %166 : vector<1x64xf32>
    %168 = vector.extract_strided_slice %164 {offsets = [0, 64], sizes = [1, 64], strides = [1, 1]} : vector<1x256xf32> to vector<1x64xf32>
    %169 = arith.addf %167, %168 : vector<1x64xf32>
    %170 = vector.extract_strided_slice %164 {offsets = [0, 128], sizes = [1, 64], strides = [1, 1]} : vector<1x256xf32> to vector<1x64xf32>
    %171 = arith.addf %169, %170 : vector<1x64xf32>
    %172 = vector.extract_strided_slice %164 {offsets = [0, 192], sizes = [1, 64], strides = [1, 1]} : vector<1x256xf32> to vector<1x64xf32>
    %173 = arith.addf %171, %172 : vector<1x64xf32>
    %174 = vector.extract_strided_slice %107 {offsets = [4, 0], sizes = [1, 256], strides = [1, 1]} : vector<8x256xf32> to vector<1x256xf32>
    %175 = arith.mulf %174, %162 : vector<1x256xf32>
    %176 = vector.extract_strided_slice %109 {offsets = [4, 0], sizes = [1, 256], strides = [1, 1]} : vector<8x256xf32> to vector<1x256xf32>
    %177 = arith.addf %175, %176 : vector<1x256xf32>
    %178 = vector.extract_strided_slice %103 {offsets = [4, 0], sizes = [1, 256], strides = [1, 1]} : vector<8x256xf32> to vector<1x256xf32>
    %179 = arith.mulf %177, %178 : vector<1x256xf32>
    %180 = vector.extract_strided_slice %112 {offsets = [4, 0], sizes = [1, 64], strides = [1, 1]} : vector<8x64xf32> to vector<1x64xf32>
    %181 = vector.extract_strided_slice %179 {offsets = [0, 0], sizes = [1, 64], strides = [1, 1]} : vector<1x256xf32> to vector<1x64xf32>
    %182 = arith.addf %180, %181 : vector<1x64xf32>
    %183 = vector.extract_strided_slice %179 {offsets = [0, 64], sizes = [1, 64], strides = [1, 1]} : vector<1x256xf32> to vector<1x64xf32>
    %184 = arith.addf %182, %183 : vector<1x64xf32>
    %185 = vector.extract_strided_slice %179 {offsets = [0, 128], sizes = [1, 64], strides = [1, 1]} : vector<1x256xf32> to vector<1x64xf32>
    %186 = arith.addf %184, %185 : vector<1x64xf32>
    %187 = vector.extract_strided_slice %179 {offsets = [0, 192], sizes = [1, 64], strides = [1, 1]} : vector<1x256xf32> to vector<1x64xf32>
    %188 = arith.addf %186, %187 : vector<1x64xf32>
    %189 = vector.extract_strided_slice %107 {offsets = [5, 0], sizes = [1, 256], strides = [1, 1]} : vector<8x256xf32> to vector<1x256xf32>
    %190 = arith.mulf %189, %177 : vector<1x256xf32>
    %191 = vector.extract_strided_slice %109 {offsets = [5, 0], sizes = [1, 256], strides = [1, 1]} : vector<8x256xf32> to vector<1x256xf32>
    %192 = arith.addf %190, %191 : vector<1x256xf32>
    %193 = vector.extract_strided_slice %103 {offsets = [5, 0], sizes = [1, 256], strides = [1, 1]} : vector<8x256xf32> to vector<1x256xf32>
    %194 = arith.mulf %192, %193 : vector<1x256xf32>
    %195 = vector.extract_strided_slice %112 {offsets = [5, 0], sizes = [1, 64], strides = [1, 1]} : vector<8x64xf32> to vector<1x64xf32>
    %196 = vector.extract_strided_slice %194 {offsets = [0, 0], sizes = [1, 64], strides = [1, 1]} : vector<1x256xf32> to vector<1x64xf32>
    %197 = arith.addf %195, %196 : vector<1x64xf32>
    %198 = vector.extract_strided_slice %194 {offsets = [0, 64], sizes = [1, 64], strides = [1, 1]} : vector<1x256xf32> to vector<1x64xf32>
    %199 = arith.addf %197, %198 : vector<1x64xf32>
    %200 = vector.extract_strided_slice %194 {offsets = [0, 128], sizes = [1, 64], strides = [1, 1]} : vector<1x256xf32> to vector<1x64xf32>
    %201 = arith.addf %199, %200 : vector<1x64xf32>
    %202 = vector.extract_strided_slice %194 {offsets = [0, 192], sizes = [1, 64], strides = [1, 1]} : vector<1x256xf32> to vector<1x64xf32>
    %203 = arith.addf %201, %202 : vector<1x64xf32>
    %204 = vector.extract_strided_slice %107 {offsets = [6, 0], sizes = [1, 256], strides = [1, 1]} : vector<8x256xf32> to vector<1x256xf32>
    %205 = arith.mulf %204, %192 : vector<1x256xf32>
    %206 = vector.extract_strided_slice %109 {offsets = [6, 0], sizes = [1, 256], strides = [1, 1]} : vector<8x256xf32> to vector<1x256xf32>
    %207 = arith.addf %205, %206 : vector<1x256xf32>
    %208 = vector.extract_strided_slice %103 {offsets = [6, 0], sizes = [1, 256], strides = [1, 1]} : vector<8x256xf32> to vector<1x256xf32>
    %209 = arith.mulf %207, %208 : vector<1x256xf32>
    %210 = vector.extract_strided_slice %112 {offsets = [6, 0], sizes = [1, 64], strides = [1, 1]} : vector<8x64xf32> to vector<1x64xf32>
    %211 = vector.extract_strided_slice %209 {offsets = [0, 0], sizes = [1, 64], strides = [1, 1]} : vector<1x256xf32> to vector<1x64xf32>
    %212 = arith.addf %210, %211 : vector<1x64xf32>
    %213 = vector.extract_strided_slice %209 {offsets = [0, 64], sizes = [1, 64], strides = [1, 1]} : vector<1x256xf32> to vector<1x64xf32>
    %214 = arith.addf %212, %213 : vector<1x64xf32>
    %215 = vector.extract_strided_slice %209 {offsets = [0, 128], sizes = [1, 64], strides = [1, 1]} : vector<1x256xf32> to vector<1x64xf32>
    %216 = arith.addf %214, %215 : vector<1x64xf32>
    %217 = vector.extract_strided_slice %209 {offsets = [0, 192], sizes = [1, 64], strides = [1, 1]} : vector<1x256xf32> to vector<1x64xf32>
    %218 = arith.addf %216, %217 : vector<1x64xf32>
    %219 = vector.extract_strided_slice %107 {offsets = [7, 0], sizes = [1, 256], strides = [1, 1]} : vector<8x256xf32> to vector<1x256xf32>
    %220 = arith.mulf %219, %207 : vector<1x256xf32>
    %221 = vector.extract_strided_slice %109 {offsets = [7, 0], sizes = [1, 256], strides = [1, 1]} : vector<8x256xf32> to vector<1x256xf32>
    %222 = arith.addf %220, %221 : vector<1x256xf32>
    %223 = vector.extract_strided_slice %103 {offsets = [7, 0], sizes = [1, 256], strides = [1, 1]} : vector<8x256xf32> to vector<1x256xf32>
    %224 = arith.mulf %222, %223 : vector<1x256xf32>
    %225 = vector.extract_strided_slice %112 {offsets = [7, 0], sizes = [1, 64], strides = [1, 1]} : vector<8x64xf32> to vector<1x64xf32>
    %226 = vector.extract_strided_slice %224 {offsets = [0, 0], sizes = [1, 64], strides = [1, 1]} : vector<1x256xf32> to vector<1x64xf32>
    %227 = arith.addf %225, %226 : vector<1x64xf32>
    %228 = vector.extract_strided_slice %224 {offsets = [0, 64], sizes = [1, 64], strides = [1, 1]} : vector<1x256xf32> to vector<1x64xf32>
    %229 = arith.addf %227, %228 : vector<1x64xf32>
    %230 = vector.extract_strided_slice %224 {offsets = [0, 128], sizes = [1, 64], strides = [1, 1]} : vector<1x256xf32> to vector<1x64xf32>
    %231 = arith.addf %229, %230 : vector<1x64xf32>
    %232 = vector.extract_strided_slice %224 {offsets = [0, 192], sizes = [1, 64], strides = [1, 1]} : vector<1x256xf32> to vector<1x64xf32>
    %233 = arith.addf %231, %232 : vector<1x64xf32>
    %234 = tpu.concatenate %128, %143, %158, %173, %188, %203, %218, %233 in 0 : vector<1x64xf32>, vector<1x64xf32>, vector<1x64xf32>, vector<1x64xf32>, vector<1x64xf32>, vector<1x64xf32>, vector<1x64xf32>, vector<1x64xf32> -> vector<8x64xf32>
    %cst_34 = arith.constant 0.000000e+00 : f32
    %235 = vector.broadcast %cst_34 : f32 to vector<8x64xf32>
    %236 = arith.subf %235, %19 : vector<8x64xf32>
    %237 = math.exp %236 : vector<8x64xf32>
    %cst_35 = arith.constant 1.000000e+00 : f32
    %238 = vector.broadcast %cst_35 : f32 to vector<8x64xf32>
    %239 = arith.addf %238, %237 : vector<8x64xf32>
    %240 = tpu.reciprocal %239 {approx = true} : vector<8x64xf32> -> vector<8x64xf32>
    %241 = arith.mulf %19, %240 : vector<8x64xf32>
    %242 = arith.mulf %234, %241 : vector<8x64xf32>
    %243 = arith.truncf %242 : vector<8x64xf32> to vector<8x64xbf16>
    %c0_36 = arith.constant 0 : index
    %c0_37 = arith.constant 0 : index
    %244 = vector.load %arg11[%c0_36, %c0_37] : memref<64x32xbf16, #tpu.memory_space<vmem>>, vector<64x32xbf16>
    %cst_38 = arith.constant dense<0.000000e+00> : vector<8x32xf32>
    %245 = tpu.matmul %243, %244, %cst_38 {dimension_numbers = #tpu.dot_dimension_numbers<[1], [0], [0], [1], [0, 0, 1, 1], [], []>} : vector<8x64xbf16>, vector<64x32xbf16>, vector<8x32xf32> -> vector<8x32xf32>
    %246 = arith.addf %1, %245 : vector<8x32xf32>
    %c0_39 = arith.constant 0 : index
    %c0_40 = arith.constant 0 : index
    %c0_41 = arith.constant 0 : index
    %247 = vector.load %arg12[%c0_39, %c0_40, %c0_41] : memref<1x8x32xf32, #tpu.memory_space<vmem>>, vector<1x8x32xf32>
    %248 = vector.shape_cast %247 : vector<1x8x32xf32> to vector<8x32xf32>
    %249 = vector.shape_cast %246 : vector<8x32xf32> to vector<1x8x32xf32>
    tpu.vector_store %arg12[%c0_39, %c0_40, %c0_41], %249 {strides = array<i32>} : memref<1x8x32xf32, #tpu.memory_space<vmem>>, vector<1x8x32xf32>,
    return
  }
  func.func @transform_0(%arg0: i32) -> (i32, i32, i32) {
    %c0_i32 = arith.constant 0 : i32
    %c0_i32_0 = arith.constant 0 : i32
    %c0_i32_1 = arith.constant 0 : i32
    return %arg0, %c0_i32, %c0_i32_0 : i32, i32, i32
  }
  func.func @transform_1(%arg0: i32) -> (i32, i32) {
    %c0_i32 = arith.constant 0 : i32
    %c0_i32_0 = arith.constant 0 : i32
    %c0_i32_1 = arith.constant 0 : i32
    return %c0_i32, %c0_i32_0 : i32, i32
  }
  func.func @transform_2(%arg0: i32) -> (i32, i32) {
    %c0_i32 = arith.constant 0 : i32
    %c0_i32_0 = arith.constant 0 : i32
    %c0_i32_1 = arith.constant 0 : i32
    return %c0_i32, %c0_i32_0 : i32, i32
  }
  func.func @transform_3(%arg0: i32) -> (i32, i32) {
    %c0_i32 = arith.constant 0 : i32
    %c0_i32_0 = arith.constant 0 : i32
    %c0_i32_1 = arith.constant 0 : i32
    return %c0_i32, %c0_i32_0 : i32, i32
  }
  func.func @transform_4(%arg0: i32) -> (i32, i32) {
    %c0_i32 = arith.constant 0 : i32
    %c0_i32_0 = arith.constant 0 : i32
    %c0_i32_1 = arith.constant 0 : i32
    return %c0_i32, %c0_i32_0 : i32, i32
  }
  func.func @transform_5(%arg0: i32) -> (i32, i32) {
    %c0_i32 = arith.constant 0 : i32
    %c0_i32_0 = arith.constant 0 : i32
    %c0_i32_1 = arith.constant 0 : i32
    return %c0_i32, %c0_i32_0 : i32, i32
  }
  func.func @transform_6(%arg0: i32) -> (i32, i32) {
    %c0_i32 = arith.constant 0 : i32
    %c0_i32_0 = arith.constant 0 : i32
    %c0_i32_1 = arith.constant 0 : i32
    return %c0_i32, %c0_i32_0 : i32, i32
  }
  func.func @transform_7(%arg0: i32) -> (i32, i32) {
    %c0_i32 = arith.constant 0 : i32
    %c0_i32_0 = arith.constant 0 : i32
    %c0_i32_1 = arith.constant 0 : i32
    return %c0_i32, %c0_i32_0 : i32, i32
  }
  func.func @transform_8(%arg0: i32) -> (i32, i32) {
    %c0_i32 = arith.constant 0 : i32
    %c0_i32_0 = arith.constant 0 : i32
    %c0_i32_1 = arith.constant 0 : i32
    return %c0_i32, %c0_i32_0 : i32, i32
  }
  func.func @transform_9(%arg0: i32) -> (i32, i32) {
    %c0_i32 = arith.constant 0 : i32
    %c0_i32_0 = arith.constant 0 : i32
    %c0_i32_1 = arith.constant 0 : i32
    return %c0_i32, %c0_i32_0 : i32, i32
  }
  func.func @transform_10(%arg0: i32) -> (i32, i32) {
    %c0_i32 = arith.constant 0 : i32
    %c0_i32_0 = arith.constant 0 : i32
    %c0_i32_1 = arith.constant 0 : i32
    return %c0_i32, %c0_i32_0 : i32, i32
  }
  func.func @transform_11(%arg0: i32) -> (i32, i32, i32) {
    %c0_i32 = arith.constant 0 : i32
    %c0_i32_0 = arith.constant 0 : i32
    %c0_i32_1 = arith.constant 0 : i32
    return %arg0, %c0_i32, %c0_i32_0 : i32, i32, i32
  }
}

</mosaic_0001>

<bundles_post_ra>
// kernel: _lambda_.5
= control target key start
LH: loop header
LB: loop body
LE: loop exit
PB: predicated region body
PF: predicated region fallthrough
CT: control target
= control target key end

     0   :  { %s1696_s0 = inlined_call_operand.vmem [shape: f32[2,8,32], index: 0, kind: input, shape index: {}]   ;;  %s1697_s1 = inlined_call_operand.vmem [shape: f32[1,32], index: 1, kind: input, shape index: {}]   ;;  %s1698_s2 = inlined_call_operand.vmem [shape: bf16[32,32], index: 2, kind: input, shape index: {}]   ;;  %s1699_s3 = inlined_call_operand.vmem [shape: f32[1,32], index: 3, kind: input, shape index: {}]   ;;  %s1700_s4 = inlined_call_operand.vmem [shape: bf16[32,64], index: 4, kind: input, shape index: {}]   ;;  %s1701_s5 = inlined_call_operand.vmem [shape: f32[1,64], index: 5, kind: input, shape index: {}]   ;;  %s1702_s6 = inlined_call_operand.vmem [shape: f32[2,8,32], index: 6, kind: input, shape index: {}]   ;;  %s1703_s7 = inlined_call_operand.vmem [shape: bf16[32,32], index: 7, kind: input, shape index: {}]   ;;  %s1704_s8 = inlined_call_operand.vmem [shape: f32[1,32], index: 8, kind: input, shape index: {}]   ;;  %s1705_s9 = inlined_call_operand.vmem [shape: f32[1,32], index: 9, kind: input, shape index: {}]   ;;  %s1706_s10 = inlined_call_operand.hbm [shape: f32[2,8,32], index: 10, kind: output, shape index: {}]  }
   0x1   :  { %1707 = sst [smem:[#allocation5_spill]] %s1696_s0 }
   0x2   :  { %15 = vsyncpa [#allocation3], 0 }
   0x3   :  { %17 = vsyncpa [#allocation3 + $0x1], 0  ;;  %s1496_s13 = smov 0   ;;  %s1498_s14 = smov 0  }
   0x4   :  { %s1500_s15 = smov 0   ;;  %s1502_s16 = smov 0  }
   0x5 LB: > { %s1517_s17 = sadd.s32 4294967295, %s1426_s16   ;;  %s1159_s18 = sadd.s32 4294967294, %s1426_s16   ;;  %s1426_s16 = sphi %s1502_s16, %s1714_s16   ;;  %s1422_s15 = sphi %s1500_s15, %s1713_s15   ;;  %s1418_s14 = sphi %s1498_s14, %s1712_s14   ;;  %s1414_s13 = sphi %s1496_s13, %s1711_s13  }
   0x6   : > { %s1521_s19 = sadd.s32 1, %s1426_s16   ;;  %s250_s20 = sadd.s32 1, %s1422_s15 }
   0x7   : > { %s247_s21 = ssub.s32 %s1426_s16, %s1521_s19  ;;  %p260_p0 = scmp.ne.s32.totalorder %s1422_s15, %s1418_s14 }
   0x8   : > { %p248_p1 = scmp.eq.s32.totalorder %s247_s21, 0  ;;  %p261_p2 = scmp.eq.s32.totalorder %s1517_s17, 1 }
   0x9   : > { %p266_p3 = scmp.ne.s32.totalorder %s1418_s14, %s1414_s13  ;;  %p267_p4 = scmp.eq.s32.totalorder %s1159_s18, 1 }
   0xa   : > { %s1532_s22 = scalar_select %p248_p1, %s1422_s15, %s250_s20  }
   0xb   : > { %p1534_p5 = por %p261_p2, %p260_p0  ;;  %p1538_p6 = por %p267_p4, %p266_p3 }
   0xc   : > { %p1162_p7 = scmp.ge.s32.totalorder %s1426_s16, 1  ;;  %p323_p8 = scmp.lt.s32.totalorder %s1426_s16, 3 }
   0xe   : > { %p324_p9 = pnand %p1162_p7, %p323_p8 }
   0xf   : > { %p364_p10 = scmp.lt.s32.totalorder (!%p324_p9), %s1517_s17, 1  ;;  %s1710_s0 = sld [smem:[#allocation5_spill]] (!%p324_p9) }
  0x10   : > { %327 = sbr.rel (%p324_p9) target bundleno = 1716 (0x6b4), region = 60  ;;  %s1430_s20 = smov (!%p324_p9), 120  }
  0x11   : > { %s1431_s21 = smov (!%p324_p9), 112   ;;  %s1432_s28 = smov (!%p324_p9), 104  }
  0x12   : > { %s1435_s30 = smov (!%p324_p9), 72   ;;  %s1436_s11 = smov (!%p324_p9), 88  }
  0x13   : > { %s1438_s27 = smov (!%p324_p9), 16  }
  0x15   : > { %s365_s25 = scalar_select %p364_p10, %s1517_s17, 1  ;;  %vm376_vm0 = vcmask 261120   ;;  %v1340_v3 = vld [vmem:[%s1700_s4 + $0x8] sm:$0xff]   ;;  %v1428_v4 = vmov 0.0   ;;  %v1341_v6 = vld [vmem:[%s1700_s4] sm:$0xff]   ;;  %vm1429_vm1 = vmmov 0  }
  0x16   : > { %1225 = vmatprep.subr.bf16.mxu1 %v1428_v4  ;;  %1217 = vmatprep.subr.bf16.mxu0 %v1428_v4  ;;  %v1342_v7 = vld [vmem:[%s1698_s2 + $0x8] sm:$0xff]   ;;  %v1343_v9 = vld [vmem:[%s1698_s2] sm:$0xff]   ;;  %vm529_vm2 = vcmask 64512   ;;  %vm595_vm3 = vcmask 1043456   ;;  %vm986_vm4 = vcmask 130048   ;;  %vm988_vm5 = vcmask 195584  }
  0x17   : > { %s1164_s26 = sshll.u32 %s365_s25, 3  ;;  %1226 = vmatpush3.bf16.msra.mxu1 %v1340_v3  ;;  %1229 = vmatprep.mubr.msk.bf16.mxu1 %vm1429_vm1, %v1428_v4  ;;  %v1166_v14 = vld [vmem:[%s1697_s1] ss:$0 sm:$0xff] }
  0x18   : > { %s367_s29 = scalar_lea.vmem %s1710_s0, %s1164_s26  ;;  %s371_s12 = scalar_lea.vmem %s1702_s6, %s1164_s26  ;;  %1227 = vmatprep.subr.bf16.mxu1 %v1428_v4  ;;  %1221 = vmatprep.mubr.msk.bf16.mxu0 %vm1429_vm1, %v1428_v4  ;;  %v1171_v18 = vld [vmem:[%s1701_s5] ss:$0 sm:$0xff] }
  0x19   : > { %v373_v0 = vld [vmem:[%s367_s29] sm:$0xff]  ;;  %1218 = vmatpush3.bf16.msra.mxu0 %v1342_v7  ;;  %s1433_s26 = smov 96   ;;  %s1434_s29 = smov 80  }
  0x1a   : > { %v375_v1 = vmul.f32 %v373_v0, %v373_v0  ;;  %v460_v5 = vld [vmem:[%s371_s12] sm:$0xff]  ;;  %1219 = vmatprep.subr.bf16.mxu0 %v1428_v4  ;;  %s1440_s12 = smov [#allocation2]  }
  0x1b   : > { %v461_v8 = vpack.c.bf16 %v460_v5, %v460_v5  ;;  %1228 = vmatpush3.bf16.msra.mxu1 %v1341_v6  ;;  %v1167_v26 = vld [vmem:[%s1699_s3] ss:$0 sm:$0xff]  ;;  %s1370_s18 = sshll.u32 %s1440_s12, 4  ;;  %s1371_s18 = int_to_ptr.vmem [resolvable:$false] %s1370_s18 }
  0x1c   : > { %v377_v2 = vsel %vm376_vm0, %v375_v1, 0.0  ;;  %1239 = vmatprep.subr.bf16.mxu1 %v1428_v4 }
  0x1d   : > { %378 = vadd.xlane.f32.xlu0 %v377_v2  ;;  %1220 = vmatpush3.bf16.msra.mxu0 %v1343_v9 }
  0x1e   : > { %1230 = vmatmul.mubr.msk.bf16.vlgmr.msra.gmra.mxu1 %vm376_vm0, %v461_v8  ;;  %1233 = vmatprep.subr.bf16.mxu0 %v1428_v4 }
  0x1f   : > { %1241 = vmatprep.mubr.msk.bf16.mxu1 %vm1429_vm1, %v1428_v4 }
  0xa6   : > { %v379_v10 = vpop.xlane.xlu0 %378 }
  0xa7   : > { %v381_v11 = vmul.f32 0.03125, %v379_v10 }
  0xa9   : > { %v382_v12 = vadd.f32 1e-05, %v381_v11 }
  0xab   : > { %1346 = vrsqrt.f32 %v382_v12 }
  0xb8   : > { %v1347_v13 = vpop.eup %1346 }
  0xb9   : > { %v384_v15 = vmul.f32 %v1347_v13, %v373_v0 }
  0xbb   : > { %v391_v16 = vmul.f32 %v1166_v14, %v384_v15 }
  0xbd   : > { %v392_v17 = vpack.c.bf16 %v391_v16, %v391_v16 }
  0xbf   : > { %1222 = vmatmul.mubr.msk.bf16.vlgmr.msra.gmra.mxu0 %vm376_vm0, %v392_v17 }
  0xc0   : > { %1235 = vmatprep.mubr.msk.bf16.mxu0 %vm1429_vm1, %v1428_v4 }
  0xde   : > { %v522_v19 = vpop.f32.mrf.mxu1 }
  0xdf   : > { %v523_v20 = vadd.f32 %v1171_v18, %v522_v19 }
  0xe0   : > { %v1231_v21 = vpop.f32.mrf.mxu1 }
  0xe1   : > { %v1587_v22 = vpack.c.bf16 %v523_v20, %v523_v20 }
  0xe2   : > { %v525_v23 = vpop.f32.mrf.mxu1 }
  0xe3   : > { %642 = vrot.lane.b32.xlu0 %v1587_v22, %s1430_s20  ;;  %753 = vrot.lane.b32.xlu1 %v1587_v22, %s1431_s21  ;;  %v534_v24 = vsel %vm529_vm2, %v1587_v22, 0 }
  0xe4   : > { %v1232_v25 = vpop.f32.mrf.mxu1  ;;  %1234 = vmatpush3.bf16.xpose.msra.mxu0 %v534_v24 }
  0xe5   : > { %1245 = vmatprep.subr.bf16.mxu0 %v1428_v4 }
 0x155   : > { %v643_v28 = vpop.permute.xlu0 %642  ;;  %v754_v35 = vpop.permute.xlu1 %753 }
 0x156   : > { %v648_v32 = vsel %vm529_vm2, %v643_v28, 0  ;;  %v759_v37 = vsel %vm529_vm2, %v754_v35, 0 }
 0x17f   : > { %v453_v27 = vpop.f32.mrf.mxu0 }
 0x180   : > { %v454_v29 = vadd.f32 %v1167_v26, %v453_v27 }
 0x181   : > { %v1223_v30 = vpop.f32.mrf.mxu0 }
 0x182   : > { %v459_v31 = vpack.c.bf16 %v454_v29, %v454_v29 }
 0x183   : > { %v456_v33 = vpop.f32.mrf.mxu0 }
 0x184   : > { %640 = vrot.lane.b32.xlu1 %v459_v31, %s1430_s20  ;;  %1236 = vmatmul.mubr.msk.bf16.vlgmr.msra.gmra.mxu0 %vm529_vm2, %v459_v31  ;;  %s1437_s20 = smov 8  }
 0x185   : > { %v1224_v34 = vpop.f32.mrf.mxu0  ;;  %1246 = vmatpush3.bf16.xpose.msra.mxu0 %v648_v32  ;;  %1247 = vmatprep.mubr.msk.bf16.mxu0 %vm1429_vm1, %v1428_v4 }
 0x186   : > { %1257 = vmatprep.subr.bf16.mxu0 %v1428_v4 }
 0x188   : > { %751 = vrot.lane.b32.xlu1 %v459_v31, %s1431_s21 }
 0x18c   : > { %864 = vrot.lane.b32.xlu1 %v1587_v22, %s1432_s28 }
 0x190   : > { %862 = vrot.lane.b32.xlu1 %v459_v31, %s1432_s28  ;;  %s1439_s28 = smov 24  }
 0x1f6   : > { %v641_v36 = vpop.permute.xlu1 %640 }
 0x1f7   : > { %1248 = vmatmul.mubr.msk.bf16.vlgmr.msra.gmra.mxu0 %vm529_vm2, %v641_v36 }
 0x1f8   : > { %1258 = vmatpush3.bf16.xpose.msra.mxu0 %v759_v37  ;;  %1259 = vmatprep.mubr.msk.bf16.mxu0 %vm1429_vm1, %v1428_v4 }
 0x1f9   : > { %1269 = vmatprep.subr.bf16.mxu0 %v1428_v4 }
 0x1fa   : > { %v752_v38 = vpop.permute.xlu1 %751 }
 0x1fe   : > { %v865_v39 = vpop.permute.xlu1 %864 }
 0x1ff   : > { %v870_v40 = vsel %vm529_vm2, %v865_v39, 0  ;;  %1260 = vmatmul.mubr.msk.bf16.vlgmr.msra.gmra.mxu0 %vm529_vm2, %v752_v38 }
 0x200   : > { %1270 = vmatpush3.bf16.xpose.msra.mxu0 %v870_v40  ;;  %1271 = vmatprep.mubr.msk.bf16.mxu0 %vm1429_vm1, %v1428_v4 }
 0x201   : > { %1281 = vmatprep.subr.bf16.mxu0 %v1428_v4 }
 0x202   : > { %v863_v41 = vpop.permute.xlu1 %862 }
 0x207   : > { %1272 = vmatmul.mubr.msk.bf16.vlgmr.msra.gmra.mxu0 %vm529_vm2, %v863_v41 }
 0x208   : > { %1285 = vmatprep.mubr.msk.bf16.mxu0 %vm1429_vm1, %v1428_v4 }
 0x244   : > { %v570_v42 = vpop.f32.mrf.mxu0 }
 0x245   : > { %v576_v43 = vmul.f32 0.35355338, %v570_v42 }
 0x246   : > { %v1237_v44 = vpop.f32.mrf.mxu0 }
 0x247   : > { %v577_v45 = vsel %vm529_vm2, %v576_v43, -inf }
 0x248   : > { %578 = vmax.xlane.f32.xlu1 %v577_v45  ;;  %v573_v46 = vpop.f32.mrf.mxu0 }
 0x24a   : > { %v1238_v47 = vpop.f32.mrf.mxu0 }
 0x2b7   : > { %v684_v48 = vpop.f32.mrf.mxu0 }
 0x2b8   : > { %v690_v49 = vmul.f32 0.35355338, %v684_v48 }
 0x2b9   : > { %v1249_v50 = vpop.f32.mrf.mxu0 }
 0x2ba   : > { %v691_v51 = vsel %vm529_vm2, %v690_v49, -inf }
 0x2bb   : > { %692 = vmax.xlane.f32.xlu0 %v691_v51  ;;  %v687_v52 = vpop.f32.mrf.mxu0  ;;  %v1344_v51 = vld [vmem:[%s1703_s7 + $0x8] sm:$0xff]  }
 0x2bc   : > { %1282 = vmatpush3.bf16.msra.mxu0 %v1344_v51 }
 0x2bd   : > { %v1250_v53 = vpop.f32.mrf.mxu0  ;;  %1283 = vmatprep.subr.bf16.mxu0 %v1428_v4 }
 0x2bf   : > { %v795_v54 = vpop.f32.mrf.mxu0 }
 0x2c0   : > { %v801_v55 = vmul.f32 0.35355338, %v795_v54  ;;  %v1345_v54 = vld [vmem:[%s1703_s7] sm:$0xff]  }
 0x2c1   : > { %v1261_v56 = vpop.f32.mrf.mxu0  ;;  %1284 = vmatpush3.bf16.msra.mxu0 %v1345_v54 }
 0x2c2   : > { %v802_v57 = vsel %vm529_vm2, %v801_v55, -inf }
 0x2c3   : > { %803 = vmax.xlane.f32.xlu1 %v802_v57  ;;  %v798_v58 = vpop.f32.mrf.mxu0 }
 0x2c5   : > { %v1262_v59 = vpop.f32.mrf.mxu0 }
 0x2c7   : > { %v906_v60 = vpop.f32.mrf.mxu0 }
 0x2c8   : > { %v912_v61 = vmul.f32 0.35355338, %v906_v60 }
 0x2c9   : > { %v1273_v62 = vpop.f32.mrf.mxu0 }
 0x2ca   : > { %v913_v63 = vsel %vm529_vm2, %v912_v61, -inf }
 0x2cb   : > { %914 = vmax.xlane.f32.xlu0 %v913_v63  ;;  %v909_v0 = vpop.f32.mrf.mxu0 }
 0x2cd   : > { %v1274_v1 = vpop.f32.mrf.mxu0 }
 0x2d1   : > { %v579_v2 = vpop.xlane.xlu1 %578 }
 0x2d2   : > { %v580_v3 = vsub.f32 %v576_v43, %v579_v2 }
 0x2d4   : > { %v581_v5 = vmul.f32 1.442695, %v580_v3 }
 0x2d6   : > { %1348 = vpow2.f32 %v581_v5 }
 0x2e3   : > { %v1349_v6 = vpop.eup %1348 }
 0x2e4   : > { %v583_v7 = vsel %vm529_vm2, %v1349_v6, 0.0 }
 0x2e5   : > { %584 = vadd.xlane.f32.xlu1 %v583_v7 }
 0x2f6   : > { %590 = vrot.lane.b32.xlu1 %v1587_v22, %s1433_s26 }
 0x344   : > { %v693_v8 = vpop.xlane.xlu0 %692 }
 0x345   : > { %v694_v9 = vsub.f32 %v690_v49, %v693_v8  ;;  %v1183_v8 = vld [vmem:[%s1704_s8] ss:$0 sm:$0xff] }
 0x347   : > { %v695_v10 = vmul.f32 1.442695, %v694_v9 }
 0x349   : > { %1350 = vpow2.f32 %v695_v10 }
 0x34c   : > { %v804_v11 = vpop.xlane.xlu1 %803 }
 0x34d   : > { %v805_v12 = vsub.f32 %v801_v55, %v804_v11 }
 0x34f   : > { %v806_v13 = vmul.f32 1.442695, %v805_v12 }
 0x351   : > { %1352 = vpow2.f32 %v806_v13 }
 0x354   : > { %v915_v14 = vpop.xlane.xlu0 %914 }
 0x355   : > { %v916_v15 = vsub.f32 %v912_v61, %v915_v14 }
 0x356   : > { %v1351_v16 = vpop.eup %1350 }
 0x357   : > { %v917_v17 = vmul.f32 1.442695, %v916_v15  ;;  %v697_v18 = vsel %vm529_vm2, %v1351_v16, 0.0 }
 0x358   : > { %698 = vadd.xlane.f32.xlu0 %v697_v18 }
 0x359   : > { %1354 = vpow2.f32 %v917_v17 }
 0x35e   : > { %v1353_v19 = vpop.eup %1352 }
 0x35f   : > { %v808_v20 = vsel %vm529_vm2, %v1353_v19, 0.0 }
 0x360   : > { %809 = vadd.xlane.f32.xlu1 %v808_v20  ;;  %v1187_v20 = vld [vmem:[%s1705_s9] ss:$0 sm:$0xff] }
 0x366   : > { %v1355_v21 = vpop.eup %1354 }
 0x367   : > { %v919_v23 = vsel %vm529_vm2, %v1355_v21, 0.0 }
 0x368   : > { %920 = vadd.xlane.f32.xlu0 %v919_v23 }
 0x36e   : > { %v585_v24 = vpop.xlane.xlu1 %584 }
 0x36f   : > { %1356 = vrcp.f32 %v585_v24 }
 0x371   : > { %814 = vrot.lane.b32.xlu1 %v1587_v22, %s1434_s29 }
 0x372   : > { %v591_v25 = vpop.permute.xlu1 %590 }
 0x373   : > { %v597_v26 = vsel %vm595_vm3, %v591_v25, 0 }
 0x374   : > { %1240 = vmatpush3.bf16.msra.mxu1 %v597_v26 }
 0x375   : > { %925 = vrot.lane.b32.xlu1 %v1587_v22, %s1435_s30  ;;  %1251 = vmatprep.subr.bf16.mxu1 %v1428_v4  ;;  %s361_s30 = sand.u32 1, %s1418_s14  }
 0x376   : > { %s1075_s29 = scalar_lea.sflag [#allocation3], %s361_s30 }
 0x37c   : > { %v1357_v27 = vpop.eup %1356 }
 0x37d   : > { %v587_v28 = vmul.f32 %v1357_v27, %v1349_v6 }
 0x37e   : > { %703 = vrot.lane.b32.xlu0 %v1587_v22, %s1436_s11  ;;  %s1163_s11 = sshll.u32 %s361_s30, 3 }
 0x37f   : > { %v588_v29 = vpack.c.bf16 %v587_v28, %v587_v28  ;;  %s363_s21 = scalar_lea.vmem [#allocation2], %s1163_s11 }
 0x380   : > { %s1088_s25 = sshll.u32 %s363_s21, 4  ;;  %s1089_s25 = int_to_ptr.vmem [resolvable:$true] %s1088_s25 }
 0x381   : > { %1242 = vmatmul.mubr.msk.bf16.vlgmr.msra.gmra.mxu1 %vm529_vm2, %v588_v29  ;;  %s1366_s0 = scalar_lea.vmem %s1089_s25, 128  ;;  %p1373_p0 = scmp.lt.s32.totalorder %s1089_s25, %s1371_s18 }
 0x382   : > { %1253 = vmatprep.mubr.msk.bf16.mxu1 %vm1429_vm1, %v1428_v4  ;;  %p1367_p11 = scmp.ne.s32.totalorder %s1089_s25, %s1366_s0 }
 0x384   : > { %p1368_p12 = pnand %p1367_p11, %p1534_p5 }
 0x386   : > { %p1369_p13 = pneg %p1368_p12 }
 0x3e1   : > { %v699_v30 = vpop.xlane.xlu0 %698 }
 0x3e2   : > { %1358 = vrcp.f32 %v699_v30 }
 0x3e9   : > { %v810_v31 = vpop.xlane.xlu1 %809 }
 0x3ea   : > { %1360 = vrcp.f32 %v810_v31 }
 0x3ed   : > { %v815_v37 = vpop.permute.xlu1 %814 }
 0x3ee   : > { %v820_v39 = vsel %vm595_vm3, %v815_v37, 0 }
 0x3ef   : > { %v1359_v32 = vpop.eup %1358 }
 0x3f0   : > { %v701_v34 = vmul.f32 %v1359_v32, %v1351_v16 }
 0x3f1   : > { %v921_v33 = vpop.xlane.xlu0 %920  ;;  %v926_v41 = vpop.permute.xlu1 %925 }
 0x3f2   : > { %1362 = vrcp.f32 %v921_v33  ;;  %v702_v22 = vpack.c.bf16 %v701_v34, %v701_v34  ;;  %v931_v44 = vsel %vm595_vm3, %v926_v41, 0 }
 0x3f5   : > { %v704_v35 = vpop.permute.xlu0 %703 }
 0x3f6   : > { %v709_v36 = vsel %vm595_vm3, %v704_v35, 0 }
 0x3f7   : > { %1252 = vmatpush3.bf16.msra.mxu1 %v709_v36  ;;  %v1361_v38 = vpop.eup %1360 }
 0x3f8   : > { %1263 = vmatprep.subr.bf16.mxu1 %v1428_v4  ;;  %v812_v40 = vmul.f32 %v1361_v38, %v1353_v19 }
 0x3fa   : > { %1254 = vmatmul.mubr.msk.bf16.vlgmr.msra.gmra.mxu1 %vm529_vm2, %v702_v22  ;;  %v813_v42 = vpack.c.bf16 %v812_v40, %v812_v40 }
 0x3fb   : > { %1264 = vmatpush3.bf16.msra.mxu1 %v820_v39  ;;  %1265 = vmatprep.mubr.msk.bf16.mxu1 %vm1429_vm1, %v1428_v4 }
 0x3fc   : > { %1275 = vmatprep.subr.bf16.mxu1 %v1428_v4 }
 0x3ff   : > { %v1363_v43 = vpop.eup %1362 }
 0x400   : > { %v923_v45 = vmul.f32 %v1363_v43, %v1355_v21 }
 0x402   : > { %1266 = vmatmul.mubr.msk.bf16.vlgmr.msra.gmra.mxu1 %vm529_vm2, %v813_v42  ;;  %v924_v46 = vpack.c.bf16 %v923_v45, %v923_v45 }
 0x403   : > { %1276 = vmatpush3.bf16.msra.mxu1 %v931_v44  ;;  %1277 = vmatprep.mubr.msk.bf16.mxu1 %vm1429_vm1, %v1428_v4 }
 0x40a   : > { %1278 = vmatmul.mubr.msk.bf16.vlgmr.msra.gmra.mxu1 %vm529_vm2, %v924_v46 }
 0x441   : > { %v633_v47 = vpop.f32.mrf.mxu1 }
 0x443   : > { %v1243_v48 = vpop.f32.mrf.mxu1 }
 0x445   : > { %v636_v49 = vpop.f32.mrf.mxu1 }
 0x447   : > { %v1244_v50 = vpop.f32.mrf.mxu1 }
 0x4ba   : > { %v745_v52 = vpop.f32.mrf.mxu1 }
 0x4bb   : > { %974 = vrot.lane.b32.xlu0 %v745_v52, %s1437_s20  ;;  %s1189_s20 = sshll.u32 %s1517_s17, 7  ;;  %s1372_s17 = scalar_lea.vmem %s1371_s18, 256 }
 0x4bc   : > { %v1255_v53 = vpop.f32.mrf.mxu1  ;;  %s1086_s26 = scalar_lea.hbm %s1706_s10, %s1189_s20  ;;  %p1374_p1 = scmp.lt.s32.totalorder %s1372_s17, %s1366_s0 }
 0x4be   : > { %v748_v55 = vpop.f32.mrf.mxu1  ;;  %p1375_p2 = por %p1374_p1, %p1373_p0 }
 0x4c0   : > { %v1256_v56 = vpop.f32.mrf.mxu1  ;;  %p1376_p3 = pnand %p1375_p2, %p1369_p13 }
 0x4c2   : > { %v856_v57 = vpop.f32.mrf.mxu1 }
 0x4c3   : > { %978 = vrot.lane.b32.xlu1 %v856_v57, %s1438_s27 }
 0x4c4   : > { %v1267_v58 = vpop.f32.mrf.mxu1 }
 0x4c6   : > { %v859_v59 = vpop.f32.mrf.mxu1 }
 0x4c8   : > { %v1268_v60 = vpop.f32.mrf.mxu1 }
 0x4ca   : > { %v967_v61 = vpop.f32.mrf.mxu1 }
 0x4cb   : > { %982 = vrot.lane.b32.xlu0 %v967_v61, %s1439_s28 }
 0x4cc   : > { %v1279_v4 = vpop.f32.mrf.mxu1 }
 0x4ce   : > { %v970_v62 = vpop.f32.mrf.mxu1 }
 0x4d0   : > { %v1280_v63 = vpop.f32.mrf.mxu1 }
 0x52d   : > { %v975_v0 = vpop.permute.xlu0 %974 }
 0x52e   : > { %v985_v2 = vsel %vm529_vm2, %v633_v47, %v975_v0 }
 0x535   : > { %v979_v1 = vpop.permute.xlu1 %978 }
 0x536   : > { %v987_v3 = vsel %vm986_vm4, %v985_v2, %v979_v1 }
 0x53d   : > { %v983_v5 = vpop.permute.xlu0 %982 }
 0x53e   : > { %v989_v6 = vsel %vm988_vm5, %v987_v3, %v983_v5 }
 0x53f   : > { %v990_v7 = vpack.c.bf16 %v989_v6, %v989_v6 }
 0x541   : > { %1286 = vmatmul.mubr.msk.bf16.vlgmr.msra.gmra.mxu0 %vm376_vm0, %v990_v7 }
 0x601   : > { %v1051_v9 = vpop.f32.mrf.mxu0 }
 0x602   : > { %v1052_v10 = vadd.f32 %v1183_v8, %v1051_v9 }
 0x603   : > { %v1287_v11 = vpop.f32.mrf.mxu0 }
 0x604   : > { %v1058_v12 = vmul.f32 %v1052_v10, %v1052_v10 }
 0x605   : > { %v1054_v13 = vpop.f32.mrf.mxu0 }
 0x606   : > { %v1059_v14 = vsel %vm376_vm0, %v1058_v12, 0.0 }
 0x607   : > { %1060 = vadd.xlane.f32.xlu1 %v1059_v14  ;;  %v1288_v15 = vpop.f32.mrf.mxu0 }
 0x690   : > { %v1061_v16 = vpop.xlane.xlu1 %1060 }
 0x691   : > { %v1062_v17 = vmul.f32 0.03125, %v1061_v16 }
 0x693   : > { %v1063_v18 = vadd.f32 1e-05, %v1062_v17 }
 0x695   : > { %1364 = vrsqrt.f32 %v1063_v18 }
 0x6a2   : > { %v1365_v19 = vpop.eup %1364 }
 0x6a3   : > { %v1065_v21 = vmul.f32 %v1365_v19, %v1052_v10 }
 0x6a5   : > { %v1072_v23 = vmul.f32 %v1187_v20, %v1065_v21 }
 0x6a7   : > { %1073 = vst.msk [vmem:[%s363_s21] sm:$0xff] %vm376_vm0, %v1072_v23 }
 0x6a8   : > { %1379 = shalt.err (!%p1376_p3)
}
 0x6a9   : > { %s1380_s11 = scalar_lea.hbm %s1086_s26, 128  ;;  %s1384_s21 = scalar_lea.hbm %s1706_s10, 256 }
 0x6aa   : > { %p1381_p4 = scmp.ne.s32.totalorder %s1086_s26, %s1380_s11  ;;  %p1385_p9 = scmp.lt.s32.totalorder %s1086_s26, %s1706_s10 }
 0x6ab   : > { %p1386_p10 = scmp.lt.s32.totalorder %s1384_s21, %s1380_s11 }
 0x6ac   : > { %p1382_p7 = pnand %p1381_p4, %p1534_p5 }
 0x6ad   : > { %p1387_p11 = por %p1386_p10, %p1385_p9 }
 0x6ae   : > { %p1383_p8 = pneg %p1382_p7 }
 0x6b0   : > { %p1388_p12 = pnand %p1387_p11, %p1383_p8 }
 0x6b2   : > { %1391 = shalt.err (!%p1388_p12)
}
 0x6b3   : > { %1289 = dma.vmem_to_hbm [thread:$0]  (%p1534_p5), %s1089_s25, 128, %s1086_s26, %s1075_s29  }
 0x6b4 PF: > { %p1295_p13 = scmp.ge.s32.totalorder %s1426_s16, 2  ;;  %s1100_s0 = sand.u32 1, %s1414_s13  }
 0x6b5   : > { %s1101_s12 = scalar_lea.sflag [#allocation3], %s1100_s0 }
 0x6b6   : > { %p1292_p0 = pnand %p1295_p13, %p1538_p6 }
 0x6b8   : > { %p1293_p1 = pneg %p1292_p0 }
 0x6ba   : > { %1409 = dma.done.wait (%p1293_p1), %s1101_s12, 128  }
 0x6bb   : > { %1411 = vsyncadd (%p1293_p1), %s1101_s12, 4294967168  ;;  %p20_p2 = scmp.ge.s32.totalorder %s1521_s19, 4   ;;  %s1711_s13 = smov %s1418_s14 }
 0x6bc   : > { %s1712_s14 = smov %s1422_s15  ;;  %s1713_s15 = smov %s1532_s22 }
 0x6bd   : > { %s1714_s16 = smov %s1521_s19  ;;  %22 = sbr.rel (!%p20_p2) target bundleno = 5 (0x5), region = 98 }
 0x6c2   :  { %1106 = vsyncpa [#allocation3], 1 }
 0x6c3   :  { %1108 = vsyncpa [#allocation3 + $0x1], 1 }

// kernel: _lambda_.3
= control target key start
LH: loop header
LB: loop body
LE: loop exit
PB: predicated region body
PF: predicated region fallthrough
CT: control target
= control target key end

     0   :  { %s1285_s17 = smov 0   ;;  %s1563_s0 = inlined_call_operand.vmem [shape: f32[2,8,32], index: 0, kind: input, shape index: {}]   ;;  %s1564_s1 = inlined_call_operand.vmem [shape: f32[1,32], index: 1, kind: input, shape index: {}]   ;;  %s1565_s2 = inlined_call_operand.vmem [shape: bf16[32,128], index: 2, kind: input, shape index: {}]   ;;  %s1566_s3 = inlined_call_operand.vmem [shape: f32[4,64], index: 3, kind: input, shape index: {}]   ;;  %s1567_s4 = inlined_call_operand.vmem [shape: f32[1,64], index: 4, kind: input, shape index: {}]   ;;  %s1568_s5 = inlined_call_operand.vmem [shape: bf16[64,10], index: 5, kind: input, shape index: {}]   ;;  %s1569_s6 = inlined_call_operand.vmem [shape: bf16[2,64], index: 6, kind: input, shape index: {}]   ;;  %s1570_s7 = inlined_call_operand.vmem [shape: f32[1,64], index: 7, kind: input, shape index: {}]   ;;  %s1571_s8 = inlined_call_operand.vmem [shape: f32[1,256], index: 8, kind: input, shape index: {}]   ;;  %s1572_s9 = inlined_call_operand.vmem [shape: f32[1,64], index: 9, kind: input, shape index: {}]   ;;  %s1573_s10 = inlined_call_operand.vmem [shape: bf16[64,32], index: 10, kind: input, shape index: {}]   ;;  %s1574_s11 = inlined_call_operand.vmem [shape: f32[2,8,32], index: 11, kind: output, shape index: {}]  }
   0x1 LB: > { %s1070_s18 = sadd.s32 4294967295, %s1212_s17   ;;  %p1074_p0 = scmp.ge.s32.totalorder %s1212_s17, 1  ;;  %s1212_s17 = sphi %s1285_s17, %s21_s17  }
   0x2   : > { %p336_p1 = scmp.lt.s32.totalorder %s1212_s17, 3 }
   0x4   : > { %p337_p2 = pnand %p1074_p0, %p336_p1 }
   0x5   : > { %p374_p3 = scmp.lt.s32.totalorder (!%p337_p2), %s1070_s18, 1  ;;  %s1220_s27 = smov (!%p337_p2), 64  }
   0x6   : > { %340 = sbr.rel (%p337_p2) target bundleno = 1358 (0x54e), region = 64 }
   0xb   : > { %s1576_s18 = smov (!%p374_p3, %s1070_s18), 1  ;;  %vm386_vm0 = vcmask 261120   ;;  %v1178_v3 = vld [vmem:[%s1565_s2 + $0x8] sm:$0xff]   ;;  %v1214_v4 = vmov 0.0   ;;  %vm1215_vm1 = vmmov 0   ;;  %v1179_v5 = vld [vmem:[%s1565_s2] sm:$0xff]   ;;  %v463_v19 = vlaneseq }
   0xc   : > { %s1075_s19 = sshll.u32 %s1576_s18, 3  ;;  %1112 = vmatprep.subr.bf16.mxu1 %v1214_v4  ;;  %1116 = vmatprep.mubr.msk.bf16.mxu1 %vm1215_vm1, %v1214_v4  ;;  %v1077_v10 = vld [vmem:[%s1564_s1] ss:$0 sm:$0xff]  ;;  %v1180_v14 = vld [vmem:[%s1568_s5 + $0x18] sm:$0xff]   ;;  %v1181_v15 = vld [vmem:[%s1568_s5 + $0x10] sm:$0xff]   ;;  %v1216_v18 = vmov 2  }
   0xd   : > { %s377_s22 = scalar_lea.vmem %s1563_s0, %s1075_s19  ;;  %1113 = vmatpush3.bf16.msra.mxu1 %v1178_v3  ;;  %1132 = vmatprep.subr.bf16.mxu0 %v1214_v4  ;;  %v1182_v16 = vld [vmem:[%s1568_s5 + $0x8] sm:$0xff]   ;;  %v1183_v17 = vld [vmem:[%s1568_s5] sm:$0xff]   ;;  %v1342_v20 = vshrl.u32 %v463_v19, 7  ;;  %vm471_vm2 = vcmask 1042432   ;;  %vm481_vm3 = vcmask 1041408   ;;  %vm491_vm4 = vcmask 1040384   ;;  %s381_s28 = scalar_lea.vmem %s1574_s11, %s1075_s19 }
   0xe   : > { %v1301_v0 = vld [vmem:[%s377_s22] sm:$0xff]  ;;  %1114 = vmatprep.subr.bf16.mxu1 %v1214_v4  ;;  %1134 = vmatprep.mubr.msk.bf16.mxu0 %vm1215_vm1, %v1214_v4  ;;  %vm546_vm5 = vcmask 523264   ;;  %vm599_vm6 = vcmask 15360   ;;  %v1217_v62 = vmov 3   ;;  %v1221_v3 = vmov 6  }
   0xf   : > { %v385_v1 = vmul.f32 %v1301_v0, %v1301_v0  ;;  %1169 = vset.pattern.permute.xlu1 %v1216_v18  ;;  %v465_v21 = vsub.s32 3, %v1342_v20  ;;  %v462_v22 = vld [vmem:[%s1566_s3] sm:$0xf]  ;;  %v475_v23 = vsub.s32 0, %v1342_v20  ;;  %v485_v24 = vsub.s32 1, %v1342_v20 }
  0x10   : > { %v495_v28 = vsub.s32 2, %v1342_v20  ;;  %v1081_v46 = vld [vmem:[%s1567_s4] ss:$0 sm:$0xff]  ;;  %vm920_vm8 = vcmask 1043456   ;;  %vm922_vm9 = vcmask 1044480   ;;  %vm924_vm10 = vcmask 1045504  }
  0x11   : > { %v387_v2 = vsel %vm386_vm0, %v385_v1, 0.0  ;;  %1115 = vmatpush3.bf16.msra.mxu1 %v1179_v5  ;;  %v466_v25 = vrot.slane %v462_v22, %v465_v21  ;;  %v476_v27 = vrot.slane %v462_v22, %v475_v23  ;;  %v486_v32 = vrot.slane %v462_v22, %v485_v24  ;;  %v591_v56 = vld [vmem:[%s1569_s6] sm:$0x1] }
  0x12   : > { %388 = vadd.xlane.f32.xlu0 %v387_v2  ;;  %1120 = vmatprep.subr.bf16.mxu1 %v1214_v4  ;;  %v496_v38 = vrot.slane %v462_v22, %v495_v28  ;;  %v604_v57 = vsel %vm491_vm4, %v591_v56, 0  ;;  %v1218_v1 = vmov 4   ;;  %v1219_v2 = vmov 5   ;;  %v701_v28 = vld [vmem:[%s1571_s8] sm:$0x3] }
  0x13   : > { %1133 = vmatpush3.bf16.msra.mxu0 %v604_v57  ;;  %v1222_v5 = vmov 7   ;;  %vm926_vm11 = vcmask 1046528  }
  0x14   : > { %1138 = vmatprep.subr.bf16.mxu0 %v1214_v4 }
  0x9b   : > { %v389_v6 = vpop.xlane.xlu0 %388 }
  0x9c   : > { %v391_v7 = vmul.f32 0.03125, %v389_v6  ;;  %v1223_v6 = vmov 9  }
  0x9e   : > { %v392_v8 = vadd.f32 1e-05, %v391_v7  ;;  %v1224_v7 = vmov 8  }
  0x9f   : > { %1175 = vset.pattern.permute.xlu0 %v1224_v7 }
  0xa0   : > { %1188 = vrsqrt.f32 %v392_v8  ;;  %v1087_v8 = vld [vmem:[%s1570_s7] ss:$0 sm:$0xff] }
  0xad   : > { %v1189_v9 = vpop.eup %1188 }
  0xae   : > { %v394_v11 = vmul.f32 %v1189_v9, %v1301_v0 }
  0xb0   : > { %v401_v12 = vmul.f32 %v1077_v10, %v394_v11 }
  0xb2   : > { %v402_v13 = vpack.c.bf16 %v401_v12, %v401_v12 }
  0xb4   : > { %1117 = vmatmul.mubr.msk.bf16.vlgmr.msra.gmra.mxu1 %vm386_vm0, %v402_v13 }
  0xb5   : > { %1128 = vmatprep.mubr.msk.bf16.mxu1 %vm1215_vm1, %v1214_v4  ;;  %1121 = vmatpush3.bf16.msra.mxu1 %v1180_v14 }
  0xb6   : > { %1122 = vmatprep.subr.bf16.mxu1 %v1214_v4 }
  0xb9   : > { %1123 = vmatpush3.bf16.msra.mxu1 %v1181_v15 }
  0xba   : > { %1124 = vmatprep.subr.bf16.mxu1 %v1214_v4 }
  0xbd   : > { %1125 = vmatpush3.bf16.msra.mxu1 %v1182_v16 }
  0xbe   : > { %1126 = vmatprep.subr.bf16.mxu1 %v1214_v4 }
  0xc1   : > { %1127 = vmatpush3.bf16.msra.mxu1 %v1183_v17 }
 0x174   : > { %v1350_v26 = vpop.f32.mrf.mxu1 }
 0x175   : > { %v469_v29 = vrot.slane %v1350_v26, 5  ;;  %v479_v30 = vrot.slane %v1350_v26, 6  ;;  %v489_v31 = vrot.slane %v1350_v26, 7  ;;  %v467_v36 = vmul.f32 %v466_v25, %v1350_v26 }
 0x176   : > { %v1118_v33 = vpop.f32.mrf.mxu1 }
 0x177   : > { %v472_v34 = vsel %vm471_vm2, 0.0, %v469_v29  ;;  %v482_v35 = vsel %vm481_vm3, 0.0, %v479_v30  ;;  %v492_v40 = vsel %vm491_vm4, 0.0, %v489_v31  ;;  %v706_v29 = vrot.slane %v701_v28, %v475_v23 }
 0x178   : > { %v477_v37 = vmul.f32 %v476_v27, %v472_v34  ;;  %v459_v39 = vpop.f32.mrf.mxu1  ;;  %v487_v42 = vmul.f32 %v486_v32, %v482_v35  ;;  %v497_v45 = vmul.f32 %v496_v38, %v492_v40  ;;  %v710_v30 = vrot.slane %v701_v28, %v485_v24 }
 0x17a   : > { %v478_v41 = vadd.f32 %v477_v37, %v467_v36  ;;  %v1119_v43 = vpop.f32.mrf.mxu1 }
 0x17c   : > { %v488_v44 = vadd.f32 %v487_v42, %v478_v41 }
 0x17e   : > { %v498_v47 = vadd.f32 %v497_v45, %v488_v44 }
 0x180   : > { %v506_v48 = vadd.f32 %v1081_v46, %v498_v47  ;;  %v928_v47 = vsub.f32 0.0, %v1350_v26 }
 0x182   : > { %v507_v49 = vsub.f32 0.0, %v506_v48 }
 0x184   : > { %v508_v50 = vmul.f32 1.442695, %v507_v49 }
 0x186   : > { %1190 = vpow2.f32 %v508_v50 }
 0x193   : > { %v1191_v51 = vpop.eup %1190 }
 0x194   : > { %v510_v52 = vadd.f32 1.0, %v1191_v51 }
 0x196   : > { %1192 = vrcp.f32 %v510_v52 }
 0x1a3   : > { %v1193_v53 = vpop.eup %1192 }
 0x1a4   : > { %v1367_v54 = vmul.f32 %v1193_v53, %v506_v48 }
 0x1a6   : > { %v513_v55 = vpack.c.bf16 %v1367_v54, %v1367_v54 }
 0x1a8   : > { %1129 = vmatmul.mubr.msk.bf16.vlgmr.msra.gmra.mxu1 %vm546_vm5, %v513_v55 }
 0x268   : > { %v584_v58 = vpop.f32.mrf.mxu1 }
 0x269   : > { %666 = vperm.xlu1 %1169, %v584_v58   ;;  %v590_v59 = vpack.c.bf16 %v584_v58, %v584_v58 }
 0x26a   : > { %v1130_v60 = vpop.f32.mrf.mxu1 }
 0x26b   : > { %1135 = vmatmul.mubr.msk.bf16.vlgmr.msra.gmra.mxu0 %vm599_vm6, %v590_v59  ;;  %v929_v59 = vmul.f32 1.442695, %v928_v47 }
 0x26c   : > { %v587_v61 = vpop.f32.mrf.mxu1  ;;  %1146 = vmatprep.mubr.msk.bf16.mxu0 %vm1215_vm1, %v1214_v4 }
 0x26d   : > { %1170 = vset.pattern.permute.xlu1 %v1217_v62 }
 0x26e   : > { %670 = vperm.xlu1 %1170, %v584_v58   ;;  %v1131_v63 = vpop.f32.mrf.mxu1 }
 0x272   : > { %1171 = vset.pattern.permute.xlu1 %v1218_v1 }
 0x273   : > { %674 = vperm.xlu1 %1171, %v584_v58  }
 0x277   : > { %1172 = vset.pattern.permute.xlu1 %v1219_v2 }
 0x278   : > { %678 = vperm.xlu1 %1172, %v584_v58  }
 0x27c   : > { %660 = vrot.lane.b32.xlu1 %v1367_v54, %s1220_s27 }
 0x27d   : > { %1173 = vset.pattern.permute.xlu1 %v1221_v3 }
 0x280   : > { %684 = vperm.xlu1 %1173, %v584_v58  }
 0x284   : > { %1174 = vset.pattern.permute.xlu1 %v1222_v5 }
 0x285   : > { %688 = vperm.xlu1 %1174, %v584_v58  }
 0x289   : > { %1176 = vset.pattern.permute.xlu1 %v1223_v6 }
 0x28a   : > { %696 = vperm.xlu1 %1176, %v584_v58  }
 0x2e4   : > { %v667_v22 = vpop.permute.xlu1 %666 }
 0x2e9   : > { %v671_v25 = vpop.permute.xlu1 %670 }
 0x2ea   : > { %v681_v40 = vsel %vm546_vm5, %v667_v22, %v671_v25 }
 0x2ee   : > { %v675_v27 = vpop.permute.xlu1 %674 }
 0x2f3   : > { %v679_v31 = vpop.permute.xlu1 %678 }
 0x2f4   : > { %v682_v41 = vsel %vm546_vm5, %v675_v27, %v679_v31 }
 0x2f7   : > { %v661_v38 = vpop.permute.xlu1 %660 }
 0x2f8   : > { %v663_v43 = vsel %vm546_vm5, %v1367_v54, %v661_v38  ;;  %v1184_v38 = vld [vmem:[%s1573_s10 + $0x18] sm:$0xff]  }
 0x2f9   : > { %1139 = vmatpush3.bf16.msra.mxu0 %v1184_v38 }
 0x2fa   : > { %1140 = vmatprep.subr.bf16.mxu0 %v1214_v4 }
 0x2fb   : > { %v685_v39 = vpop.permute.xlu1 %684 }
 0x300   : > { %v689_v42 = vpop.permute.xlu1 %688 }
 0x301   : > { %v1410_v52 = vsel %vm546_vm5, %v685_v39, %v689_v42 }
 0x305   : > { %v697_v53 = vpop.permute.xlu1 %696 }
 0x32b   : > { %v640_v9 = vpop.f32.mrf.mxu0 }
 0x32c   : > { %v641_v10 = vadd.f32 %v1087_v8, %v640_v9 }
 0x32d   : > { %v1136_v11 = vpop.f32.mrf.mxu0 }
 0x32e   : > { %v646_v12 = vmin.f32 %v641_v10, 20.0  ;;  %vm652_vm7 = vcmp.gt.f32.partialorder %v641_v10, 20.0 }
 0x32f   : > { %v643_v13 = vpop.f32.mrf.mxu0 }
 0x330   : > { %v647_v14 = vmul.f32 1.442695, %v646_v12 }
 0x331   : > { %v1137_v15 = vpop.f32.mrf.mxu0 }
 0x332   : > { %1194 = vpow2.f32 %v647_v14 }
 0x33f   : > { %v1195_v16 = vpop.eup %1194 }
 0x340   : > { %v649_v17 = vadd.f32 1.0, %v1195_v16 }
 0x342   : > { %1196 = vlog2.f32 %v649_v17 }
 0x34f   : > { %v1197_v18 = vpop.eup %1196 }
 0x350   : > { %v651_v19 = vmul.f32 0.6931472, %v1197_v18 }
 0x352   : > { %v653_v21 = vsel %vm652_vm7, %v641_v10, %v651_v19 }
 0x353   : > { %655 = vrot.lane.b32.xlu0 %v653_v21, %s1220_s27 }
 0x357   : > { %692 = vperm.xlu0 %1175, %v584_v58  }
 0x35b   : > { %1177 = vset.pattern.permute.xlu0 %v1223_v6 }
 0x3c5   : > { %v656_v32 = vpop.permute.xlu0 %655 }
 0x3c6   : > { %v658_v33 = vsel %vm546_vm5, %v653_v21, %v656_v32 }
 0x3c7   : > { %v713_v34 = vmul.f32 %v706_v29, %v658_v33  ;;  %v714_v35 = vmul.f32 %v710_v30, %v658_v33  ;;  %v719_v23 = vmul.f32 %v681_v40, %v658_v33  ;;  %v720_v20 = vmul.f32 %v682_v41, %v658_v33 }
 0x3c9   : > { %v715_v36 = vmul.f32 1.442695, %v713_v34  ;;  %v717_v37 = vmul.f32 1.442695, %v714_v35  ;;  %v1401_v45 = vmul.f32 %v719_v23, %v663_v43  ;;  %v1405_v48 = vmul.f32 %v720_v20, %v663_v43  ;;  %v1185_v43 = vld [vmem:[%s1573_s10 + $0x10] sm:$0xff]  }
 0x3ca   : > { %1141 = vmatpush3.bf16.msra.mxu0 %v1185_v43 }
 0x3cb   : > { %1198 = vpow2.f32 %v715_v36  ;;  %1142 = vmatprep.subr.bf16.mxu0 %v1214_v4 }
 0x3cc   : > { %1200 = vpow2.f32 %v717_v37 }
 0x3cd   : > { %1202 = vpow2.f32 %v929_v59 }
 0x3d2   : > { %v693_v49 = vpop.permute.xlu0 %692 }
 0x3d3   : > { %v1414_v56 = vsel %vm546_vm5, %v693_v49, %v697_v53  ;;  %v1186_v53 = vld [vmem:[%s1573_s10 + $0x8] sm:$0xff]  }
 0x3d4   : > { %1143 = vmatpush3.bf16.msra.mxu0 %v1186_v53 }
 0x3d5   : > { %1144 = vmatprep.subr.bf16.mxu0 %v1214_v4 }
 0x3d8   : > { %v1395_v24 = vpop.eup %1198 }
 0x3d9   : > { %v1399_v44 = vpop.eup %1200  ;;  %v731_v46 = vmul.f32 0.0, %v1395_v24 }
 0x3da   : > { %v732_v50 = vmul.f32 0.0, %v1399_v44  ;;  %v1203_v21 = vpop.eup %1202 }
 0x3db   : > { %v733_v51 = vadd.f32 %v731_v46, %v1401_v45  ;;  %v931_v30 = vadd.f32 1.0, %v1203_v21 }
 0x3dc   : > { %v734_v55 = vadd.f32 %v732_v50, %v1405_v48 }
 0x3dd   : > { %v1417_v57 = vmul.f32 %v733_v51, %v1410_v52  ;;  %v751_v58 = vrot.slane %v733_v51, 7  ;;  %1204 = vrcp.f32 %v931_v30 }
 0x3de   : > { %v1420_v60 = vmul.f32 %v734_v55, %v1414_v56  ;;  %v752_v61 = vrot.slane %v734_v55, 7 }
 0x3df   : > { %739 = vrot.lane.b32.xlu1 %v1417_v57, %s1220_s27  ;;  %v755_v62 = vmul.f32 %v1395_v24, %v751_v58 }
 0x3e0   : > { %745 = vrot.lane.b32.xlu0 %v1420_v60, %s1220_s27  ;;  %v756_v63 = vmul.f32 %v1399_v44, %v752_v61 }
 0x3e1   : > { %v757_v1 = vadd.f32 %v755_v62, %v1401_v45 }
 0x3e2   : > { %v758_v2 = vadd.f32 %v756_v63, %v1405_v48 }
 0x3e3   : > { %v1431_v3 = vmul.f32 %v757_v1, %v1410_v52  ;;  %v775_v5 = vrot.slane %v757_v1, 7 }
 0x3e4   : > { %v1434_v6 = vmul.f32 %v758_v2, %v1414_v56  ;;  %v776_v7 = vrot.slane %v758_v2, 7  ;;  %v1187_v2 = vld [vmem:[%s1573_s10] sm:$0xff]  }
 0x3e5   : > { %763 = vrot.lane.b32.xlu0 %v1431_v3, %s1220_s27  ;;  %v779_v8 = vmul.f32 %v1395_v24, %v775_v5  ;;  %1145 = vmatpush3.bf16.msra.mxu0 %v1187_v2 }
 0x3e6   : > { %769 = vrot.lane.b32.xlu1 %v1434_v6, %s1220_s27  ;;  %v780_v9 = vmul.f32 %v1399_v44, %v776_v7 }
 0x3e7   : > { %v781_v10 = vadd.f32 %v779_v8, %v1401_v45 }
 0x3e8   : > { %v782_v11 = vadd.f32 %v780_v9, %v1405_v48 }
 0x3e9   : > { %v1445_v12 = vmul.f32 %v781_v10, %v1410_v52  ;;  %v799_v13 = vrot.slane %v781_v10, 7 }
 0x3ea   : > { %v800_v14 = vrot.slane %v782_v11, 7  ;;  %v1452_v17 = vmul.f32 %v782_v11, %v1414_v56  ;;  %v1205_v62 = vpop.eup %1204 }
 0x3eb   : > { %787 = vrot.lane.b32.xlu1 %v1445_v12, %s1220_s27  ;;  %v803_v15 = vmul.f32 %v1395_v24, %v799_v13  ;;  %v933_v4 = vmul.f32 %v1205_v62, %v1350_v26 }
 0x3ec   : > { %v804_v16 = vmul.f32 %v1399_v44, %v800_v14 }
 0x3ed   : > { %v805_v18 = vadd.f32 %v803_v15, %v1401_v45 }
 0x3ee   : > { %v806_v19 = vadd.f32 %v804_v16, %v1405_v48 }
 0x3ef   : > { %793 = vrot.lane.b32.xlu1 %v1452_v17, %s1220_s27  ;;  %v1459_v22 = vmul.f32 %v805_v18, %v1410_v52  ;;  %v823_v25 = vrot.slane %v805_v18, 7 }
 0x3f0   : > { %v824_v27 = vrot.slane %v806_v19, 7  ;;  %v1464_v28 = vmul.f32 %v806_v19, %v1414_v56 }
 0x3f1   : > { %811 = vrot.lane.b32.xlu0 %v1459_v22, %s1220_s27  ;;  %v827_v29 = vmul.f32 %v1395_v24, %v823_v25 }
 0x3f2   : > { %v828_v31 = vmul.f32 %v1399_v44, %v824_v27 }
 0x3f3   : > { %817 = vrot.lane.b32.xlu1 %v1464_v28, %s1220_s27  ;;  %v829_v32 = vadd.f32 %v827_v29, %v1401_v45 }
 0x3f4   : > { %v830_v33 = vadd.f32 %v828_v31, %v1405_v48 }
 0x3f5   : > { %v1473_v34 = vmul.f32 %v829_v32, %v1410_v52  ;;  %v847_v35 = vrot.slane %v829_v32, 7 }
 0x3f6   : > { %v848_v36 = vrot.slane %v830_v33, 7  ;;  %v1483_v40 = vmul.f32 %v830_v33, %v1414_v56 }
 0x3f7   : > { %835 = vrot.lane.b32.xlu1 %v1473_v34, %s1220_s27  ;;  %v851_v37 = vmul.f32 %v1395_v24, %v847_v35 }
 0x3f8   : > { %v852_v39 = vmul.f32 %v1399_v44, %v848_v36 }
 0x3f9   : > { %v853_v41 = vadd.f32 %v851_v37, %v1401_v45 }
 0x3fa   : > { %v854_v23 = vadd.f32 %v852_v39, %v1405_v48 }
 0x3fb   : > { %841 = vrot.lane.b32.xlu1 %v1483_v40, %s1220_s27  ;;  %v1491_v42 = vmul.f32 %v853_v41, %v1410_v52  ;;  %v871_v20 = vrot.slane %v853_v41, 7 }
 0x3fc   : > { %v872_v46 = vrot.slane %v854_v23, 7  ;;  %v1502_v50 = vmul.f32 %v854_v23, %v1414_v56 }
 0x3fd   : > { %859 = vrot.lane.b32.xlu0 %v1491_v42, %s1220_s27  ;;  %v875_v47 = vmul.f32 %v1395_v24, %v871_v20 }
 0x3fe   : > { %v876_v49 = vmul.f32 %v1399_v44, %v872_v46 }
 0x3ff   : > { %v877_v51 = vadd.f32 %v875_v47, %v1401_v45 }
 0x400   : > { %v878_v55 = vadd.f32 %v876_v49, %v1405_v48 }
 0x401   : > { %865 = vrot.lane.b32.xlu0 %v1502_v50, %s1220_s27  ;;  %v895_v58 = vrot.slane %v877_v51, 7  ;;  %v879_v63 = vmul.f32 %v877_v51, %v1410_v52 }
 0x402   : > { %v1512_v59 = vmul.f32 %v878_v55, %v1414_v56  ;;  %v896_v61 = vrot.slane %v878_v55, 7 }
 0x403   : > { %v899_v1 = vmul.f32 %v1395_v24, %v895_v58 }
 0x404   : > { %889 = vrot.lane.b32.xlu1 %v1512_v59, %s1220_s27  ;;  %v900_v5 = vmul.f32 %v1399_v44, %v896_v61  ;;  %v1089_v44 = vld [vmem:[%s1572_s9] ss:$0 sm:$0xff] }
 0x405   : > { %883 = vrot.lane.b32.xlu0 %v879_v63, %s1220_s27  ;;  %v901_v7 = vadd.f32 %v899_v1, %v1401_v45  ;;  %v730_v45 = vmul.f32 %v1089_v44, %v1367_v54 }
 0x406   : > { %v902_v24 = vadd.f32 %v900_v5, %v1405_v48 }
 0x407   : > { %v903_v8 = vmul.f32 %v901_v7, %v1410_v52  ;;  %v737_v26 = vadd.f32 %v1417_v57, %v730_v45  ;;  %v761_v48 = vadd.f32 %v1431_v3, %v730_v45  ;;  %v785_v21 = vadd.f32 %v1445_v12, %v730_v45 }
 0x408   : > { %935 = vrot.lane.b32.xlu1 %v933_v4, %s1220_s27  ;;  %v904_v9 = vmul.f32 %v902_v24, %v1414_v56  ;;  %v809_v3 = vadd.f32 %v1459_v22, %v730_v45  ;;  %v833_v12 = vadd.f32 %v1473_v34, %v730_v45  ;;  %v857_v22 = vadd.f32 %v1491_v42, %v730_v45 }
 0x409   : > { %907 = vrot.lane.b32.xlu0 %v903_v8, %s1220_s27  ;;  %v881_v49 = vadd.f32 %v879_v63, %v730_v45 }
 0x40d   : > { %913 = vrot.lane.b32.xlu0 %v904_v9, %s1220_s27 }
 0x451   : > { %v740_v10 = vpop.permute.xlu1 %739 }
 0x452   : > { %v746_v52 = vpop.permute.xlu0 %745  ;;  %v742_v11 = vadd.f32 %v740_v10, %v737_v26 }
 0x454   : > { %v743_v14 = vadd.f32 %v742_v11, %v1420_v60 }
 0x456   : > { %v748_v18 = vadd.f32 %v746_v52, %v743_v14 }
 0x457   : > { %v764_v13 = vpop.permute.xlu0 %763 }
 0x458   : > { %v766_v15 = vadd.f32 %v764_v13, %v761_v48  ;;  %v770_v56 = vpop.permute.xlu1 %769 }
 0x45a   : > { %v767_v16 = vadd.f32 %v766_v15, %v1434_v6 }
 0x45c   : > { %v772_v19 = vadd.f32 %v770_v56, %v767_v16 }
 0x45d   : > { %v788_v25 = vpop.permute.xlu1 %787 }
 0x45e   : > { %v790_v54 = vadd.f32 %v788_v25, %v785_v21  ;;  %v917_v27 = vsel %vm491_vm4, %v748_v18, %v772_v19 }
 0x460   : > { %v791_v57 = vadd.f32 %v790_v54, %v1452_v17 }
 0x461   : > { %v794_v29 = vpop.permute.xlu1 %793 }
 0x462   : > { %v796_v30 = vadd.f32 %v794_v29, %v791_v57 }
 0x463   : > { %v812_v31 = vpop.permute.xlu0 %811 }
 0x464   : > { %v918_v60 = vsel %vm481_vm3, %v917_v27, %v796_v30  ;;  %v814_v32 = vadd.f32 %v812_v31, %v809_v3 }
 0x465   : > { %v818_v33 = vpop.permute.xlu1 %817 }
 0x466   : > { %v815_v6 = vadd.f32 %v814_v32, %v1464_v28 }
 0x468   : > { %v820_v35 = vadd.f32 %v818_v33, %v815_v6 }
 0x469   : > { %v836_v36 = vpop.permute.xlu1 %835 }
 0x46a   : > { %v919_v37 = vsel %vm471_vm2, %v918_v60, %v820_v35  ;;  %v838_v38 = vadd.f32 %v836_v36, %v833_v12 }
 0x46c   : > { %v839_v17 = vadd.f32 %v838_v38, %v1483_v40  ;;  %v905_v40 = vadd.f32 %v903_v8, %v730_v45 }
 0x46d   : > { %v842_v39 = vpop.permute.xlu1 %841 }
 0x46e   : > { %v844_v41 = vadd.f32 %v842_v39, %v839_v17 }
 0x46f   : > { %v860_v23 = vpop.permute.xlu0 %859 }
 0x470   : > { %v921_v20 = vsel %vm920_vm8, %v919_v37, %v844_v41  ;;  %v862_v43 = vadd.f32 %v860_v23, %v857_v22 }
 0x472   : > { %v863_v46 = vadd.f32 %v862_v43, %v1502_v50 }
 0x473   : > { %v866_v28 = vpop.permute.xlu0 %865 }
 0x474   : > { %v868_v47 = vadd.f32 %v866_v28, %v863_v46 }
 0x476   : > { %v923_v34 = vsel %vm922_vm9, %v921_v20, %v868_v47  ;;  %v890_v58 = vpop.permute.xlu1 %889 }
 0x477   : > { %v884_v51 = vpop.permute.xlu0 %883 }
 0x478   : > { %v886_v53 = vadd.f32 %v884_v51, %v881_v49 }
 0x47a   : > { %v887_v55 = vadd.f32 %v886_v53, %v1512_v59  ;;  %v936_v7 = vpop.permute.xlu1 %935 }
 0x47b   : > { %v908_v61 = vpop.permute.xlu0 %907 }
 0x47c   : > { %v892_v42 = vadd.f32 %v890_v58, %v887_v55  ;;  %v910_v62 = vadd.f32 %v908_v61, %v905_v40 }
 0x47e   : > { %v911_v1 = vadd.f32 %v910_v62, %v904_v9  ;;  %v925_v2 = vsel %vm924_vm10, %v923_v34, %v892_v42 }
 0x47f   : > { %v914_v50 = vpop.permute.xlu0 %913 }
 0x480   : > { %v916_v5 = vadd.f32 %v914_v50, %v911_v1 }
 0x482   : > { %v927_v4 = vsel %vm926_vm11, %v925_v2, %v916_v5 }
 0x483   : > { %v938_v24 = vmul.f32 %v936_v7, %v927_v4 }
 0x485   : > { %v939_v63 = vpack.c.bf16 %v938_v24, %v938_v24 }
 0x487   : > { %1147 = vmatmul.mubr.msk.bf16.vlgmr.msra.gmra.mxu0 %vm546_vm5, %v939_v63 }
 0x547   : > { %v1009_v59 = vpop.f32.mrf.mxu0 }
 0x548   : > { %v1015_v8 = vadd.f32 %v1009_v59, %v1301_v0 }
 0x549   : > { %v1148_v44 = vpop.f32.mrf.mxu0 }
 0x54a   : > { %1016 = vst.msk [vmem:[%s381_s28] sm:$0xff] %vm386_vm0, %v1015_v8 }
 0x54b   : > { %v1012_v9 = vpop.f32.mrf.mxu0 }
 0x54d   : > { %v1149_v45 = vpop.f32.mrf.mxu0 }
 0x54e PF: > { %s21_s17 = sadd.s32 1, %s1212_s17  }
 0x54f   : > { %p18_p4 = scmp.ge.s32.totalorder %s21_s17, 4  }
 0x551   :  { %20 = sbr.rel (!%p18_p4) target bundleno = 1 (0x1), region = 94 }

</bundles_post_ra>
